<compile_context>
chip_gen: v7x
topology: tpu7x:2x2x1
jax: 0.10.0
libtpu: 0.0.40
codegen_flags: <defaults>
</compile_context>

<pallas_src>
import functools

import jax
import jax.numpy as jnp
from jax.experimental import pallas as pl
from jax.experimental.pallas import tpu as pltpu


def _round_up(x, m):
    return (x + m - 1) // m * m


# ----------------------------------------------------------------------------
# Fused Pallas kernel: all GIN layers + global_mean_pool + graph_pred_linear
# ----------------------------------------------------------------------------
def fused_gnn_kernel(ope_ref,            # (1, 1, Dp)  f32  1+eps_l broadcast row (per layer)
                     w1_ref, b1_ref,     # (1, Dp, Hp) dt, (1, 1, Hp) f32   BN1-folded linear 1
                     w2_ref, b2_ref,     # (1, Hp, Dp) dt, (1, 1, Dp) f32   BN2-folded linear 2
                     adj_ref,            # (Np, Np)    dt   dense adjacency (resident)
                     pool_ref,           # (Gp, Np)    dt   mean-pool matrix (resident)
                     wp_ref, bp_ref,     # (Dp, Tp) dt, (1, Tp) f32         graph_pred_linear
                     h0_hbm,             # (Np, Dp)    f32  initial node features (HBM / ANY)
                     out_ref,            # (Gp, Tp)    f32  graph predictions
                     h_scratch,          # VMEM (Np, Dp) f32  node features carried across layers
                     h0_sem,             # DMA semaphore for the one-time h0 copy
                     *, matmul_dtype):
    l = pl.program_id(0)
    n_layers = pl.num_programs(0)
    dt = matmul_dtype

    # One-time copy of the encoded node features HBM -> VMEM scratch (layer 0 only).
    @pl.when(l == 0)
    def _init():
        cp = pltpu.make_async_copy(h0_hbm, h_scratch, h0_sem)
        cp.start()
        cp.wait()

    h = h_scratch[...]                                     # f32 (Np, Dp)

    # GINConv aggregation: sum over neighbours == A @ H (MXU, dt operands / f32 acc).
    aggr = jnp.dot(adj_ref[...], h.astype(dt), preferred_element_type=jnp.float32)
    z = ope_ref[0] * h + aggr                              # (1 + eps_l) * h + aggr

    # GIN MLP: Linear -> BN(2D) -> ReLU -> Linear, then outer BatchNorm1d(D);
    # both BatchNorms (eval, running stats) are pre-folded into w/b in the wrapper.
    y = jnp.dot(z.astype(dt), w1_ref[0], preferred_element_type=jnp.float32) + b1_ref[0]
    y = jnp.maximum(y, 0.0)
    y = jnp.dot(y.astype(dt), w2_ref[0], preferred_element_type=jnp.float32) + b2_ref[0]

    h_scratch[...] = y

    # ReLU on all but the last layer (dropout is identity in eval mode).
    # TODO(synk): F.dropout with training=True is stochastic; eval-mode identity here.
    @pl.when(l < n_layers - 1)
    def _relu():
        h_scratch[...] = jnp.maximum(h_scratch[...], 0.0)

    # Fused epilogue on the final layer: global_mean_pool + graph_pred_linear.
    @pl.when(l == n_layers - 1)
    def _final():
        pooled = jnp.dot(pool_ref[...], y.astype(dt), preferred_element_type=jnp.float32)
        out_ref[...] = jnp.dot(pooled.astype(dt), wp_ref[...],
                               preferred_element_type=jnp.float32) + bp_ref[...]


# ----------------------------------------------------------------------------
# Parameter folding / padding (BatchNorm eval-mode folded into the linears)
# ----------------------------------------------------------------------------
def fold_bn(gamma, beta, mean, var, eps=1e-5):
    scale = gamma / jnp.sqrt(var + eps)
    shift = beta - mean * scale
    return scale, shift


def build_fused_params(params, Dp, Hp, Tp, matmul_dtype):
    D = params["node_emb"].shape[1]
    H = 2 * D
    T = params["wp"].shape[1]
    w1s, b1s, w2s, b2s, opes = [], [], [], [], []
    for lp in params["layers"]:
        s1, t1 = fold_bn(lp["bn1_g"], lp["bn1_b"], lp["bn1_m"], lp["bn1_v"])
        s2, t2 = fold_bn(lp["bn2_g"], lp["bn2_b"], lp["bn2_m"], lp["bn2_v"])
        w1f = lp["w1"] * s1[None, :]
        b1f = lp["b1"] * s1 + t1
        w2f = lp["w2"] * s2[None, :]
        b2f = lp["b2"] * s2 + t2
        w1s.append(jnp.pad(w1f, ((0, Dp - D), (0, Hp - H))))
        b1s.append(jnp.pad(b1f, (0, Hp - H))[None, :])
        w2s.append(jnp.pad(w2f, ((0, Hp - H), (0, Dp - D))))
        b2s.append(jnp.pad(b2f, (0, Dp - D))[None, :])
        opes.append(jnp.full((1, Dp), 1.0 + lp["eps"][0], jnp.float32))
    # Matmul operands pre-cast to matmul_dtype in the wrapper (not per layer in-kernel).
    w1_all = jnp.stack(w1s).astype(matmul_dtype)   # (L, Dp, Hp)
    b1_all = jnp.stack(b1s).astype(jnp.float32)    # (L, 1, Hp)
    w2_all = jnp.stack(w2s).astype(matmul_dtype)   # (L, Hp, Dp)
    b2_all = jnp.stack(b2s).astype(jnp.float32)    # (L, 1, Dp)
    ope_all = jnp.stack(opes).astype(jnp.float32)  # (L, 1, Dp)
    wp_p = jnp.pad(params["wp"], ((0, Dp - D), (0, Tp - T))).astype(matmul_dtype)
    bp_p = jnp.pad(params["bp"], (0, Tp - T))[None, :].astype(jnp.float32)
    return w1_all, b1_all, w2_all, b2_all, ope_all, wp_p, bp_p


# ----------------------------------------------------------------------------
# Wrapper: single fused pallas_call over a layer grid
# ----------------------------------------------------------------------------
def gnn_forward(params, x_idx, adj, pool_mat, *, matmul_dtype=jnp.bfloat16):
    D = params["node_emb"].shape[1]
    H = 2 * D
    T = params["wp"].shape[1]
    N = adj.shape[0]
    G = pool_mat.shape[0]
    L = len(params["layers"])

    Dp = _round_up(D, 128)   # lane-dense feature dim
    Hp = _round_up(H, 128)   # lane-dense hidden dim
    Tp = _round_up(T, 128)   # lane-dense task dim
    Np = _round_up(N, 128)   # lane-dense node dim (adjacency / pool lanes)
    Gp = _round_up(G, 16)    # sublane-aligned graph dim (bf16-safe)

    # Node encoder: Embedding(8, emb_dim) lookup (gather glue), zero-padded, f32.
    emb = jnp.pad(params["node_emb"].astype(jnp.float32), ((0, 0), (0, Dp - D)))
    h0 = jnp.pad(emb[x_idx], ((0, Np - N), (0, 0)))
    adj_p = jnp.pad(adj.astype(jnp.float32),
                    ((0, Np - N), (0, Np - N))).astype(matmul_dtype)
    pool_p = jnp.pad(pool_mat.astype(jnp.float32),
                     ((0, Gp - G), (0, Np - N))).astype(matmul_dtype)

    (w1_all, b1_all, w2_all, b2_all, ope_all, wp_p, bp_p) = build_fused_params(
        params, Dp, Hp, Tp, matmul_dtype)

    # VMEM budget (bytes): single-buffered residents + double-buffered per-layer
    # weight slices + f32 feature scratch + f32 out block.
    bw = jnp.dtype(matmul_dtype).itemsize
    resident = bw * (Np * Np + Gp * Np + Dp * Tp) + 4 * (Tp + Gp * Tp)
    per_layer = 2 * (bw * (Dp * Hp + Hp * Dp) + 4 * (2 * Dp + Hp + Dp))
    vmem_est = resident + per_layer + 4 * Np * Dp

    try:
        vmem_cap = pltpu.get_tpu_info().vmem_capacity_bytes   # 128 MiB v5e/v6e, 64 MiB v7x
    except Exception:
        vmem_cap = 128 * 1024 * 1024
    budget = int(0.70 * vmem_cap)
    # TODO(synk): for node counts where the resident adjacency overflows this budget,
    # switch to a node-row-tiled grid with block-diagonal (per-graph) aggregation.
    assert vmem_est < budget, "graph too large for the fully-fused kernel"
    vmem_limit = int(min(budget, max(32 * 1024 * 1024, 2 * vmem_est)))

    def make_in_specs(single_buffer_residents):
        res_kw = dict(pipeline_mode=pl.Buffered(1)) if single_buffer_residents else {}
        return [
            pl.BlockSpec((1, 1, Dp), lambda l: (l, 0, 0)),            # 1+eps_l (per layer)
            pl.BlockSpec((1, Dp, Hp), lambda l: (l, 0, 0)),           # W1' (per layer)
            pl.BlockSpec((1, 1, Hp), lambda l: (l, 0, 0)),            # b1' (per layer)
            pl.BlockSpec((1, Hp, Dp), lambda l: (l, 0, 0)),           # W2' (per layer)
            pl.BlockSpec((1, 1, Dp), lambda l: (l, 0, 0)),            # b2' (per layer)
            pl.BlockSpec((Np, Np), lambda l: (0, 0), **res_kw),       # adjacency (resident)
            pl.BlockSpec((Gp, Np), lambda l: (0, 0), **res_kw),       # pool matrix (resident)
            pl.BlockSpec((Dp, Tp), lambda l: (0, 0), **res_kw),       # Wp (resident)
            pl.BlockSpec((1, Tp), lambda l: (0, 0), **res_kw),        # bp (resident)
            pl.BlockSpec(memory_space=pl.ANY),                        # h0 (stays in HBM)
        ]

    def run(single_buffer_residents):
        return pl.pallas_call(
            functools.partial(fused_gnn_kernel, matmul_dtype=matmul_dtype),
            out_shape=jax.ShapeDtypeStruct((Gp, Tp), jnp.float32),
            grid_spec=pltpu.PrefetchScalarGridSpec(
                num_scalar_prefetch=0,
                grid=(L,),
                in_specs=make_in_specs(single_buffer_residents),
                out_specs=pl.BlockSpec((Gp, Tp), lambda l: (0, 0)),
                scratch_shapes=[pltpu.VMEM((Np, Dp), jnp.float32),
                                pltpu.SemaphoreType.DMA(())],
            ),
            compiler_params=pltpu.CompilerParams(
                dimension_semantics=("arbitrary",),   # layer axis carries H -> sequential
                vmem_limit_bytes=vmem_limit,
            ),
        )(ope_all, w1_all, b1_all, w2_all, b2_all, adj_p, pool_p, wp_p, bp_p, h0)

    try:
        out = run(True)
    except Exception:
        # Fallback for jax builds without pipeline_mode / Buffered(1) support.
        out = run(False)

    return out[:G, :T]


# ----------------------------------------------------------------------------
# Pure-JAX reference (eval-mode semantics) for correctness checking
# ----------------------------------------------------------------------------
def gnn_reference(params, x_idx, adj, pool_mat):
    h = params["node_emb"][x_idx]
    L = len(params["layers"])
    for i, lp in enumerate(params["layers"]):
        aggr = adj @ h
        z = (1.0 + lp["eps"][0]) * h + aggr
        y = z @ lp["w1"] + lp["b1"]
        y = (y - lp["bn1_m"]) / jnp.sqrt(lp["bn1_v"] + 1e-5) * lp["bn1_g"] + lp["bn1_b"]
        y = jnp.maximum(y, 0.0)
        y = y @ lp["w2"] + lp["b2"]
        y = (y - lp["bn2_m"]) / jnp.sqrt(lp["bn2_v"] + 1e-5) * lp["bn2_g"] + lp["bn2_b"]
        if i != L - 1:
            y = jnp.maximum(y, 0.0)
        h = y
    pooled = pool_mat @ h
    return pooled @ params["wp"] + params["bp"]


# ----------------------------------------------------------------------------
# Deterministic parameter / data construction and smoke test
# ----------------------------------------------------------------------------
def make_params(key, emb_dim, num_layers, num_tasks):
    hid = 2 * emb_dim
    keys = iter(jax.random.split(key, 3 + 13 * num_layers))
    params = {
        "node_emb": 0.1 * jax.random.normal(next(keys), (8, emb_dim), jnp.float32),
        "layers": [],
    }
    for _ in range(num_layers):
        lp = {
            "eps": 0.05 * jax.random.normal(next(keys), (1,), jnp.float32),
            "w1": 0.1 * jax.random.normal(next(keys), (emb_dim, hid), jnp.float32),
            "b1": 0.1 * jax.random.normal(next(keys), (hid,), jnp.float32),
            "bn1_g": 1.0 + 0.1 * jax.random.normal(next(keys), (hid,), jnp.float32),
            "bn1_b": 0.1 * jax.random.normal(next(keys), (hid,), jnp.float32),
            "bn1_m": 0.05 * jax.random.normal(next(keys), (hid,), jnp.float32),
            "bn1_v": jnp.abs(1.0 + 0.1 * jax.random.normal(next(keys), (hid,), jnp.float32)),
            "w2": 0.1 * jax.random.normal(next(keys), (hid, emb_dim), jnp.float32),
            "b2": 0.1 * jax.random.normal(next(keys), (emb_dim,), jnp.float32),
            "bn2_g": 1.0 + 0.1 * jax.random.normal(next(keys), (emb_dim,), jnp.float32),
            "bn2_b": 0.1 * jax.random.normal(next(keys), (emb_dim,), jnp.float32),
            "bn2_m": 0.05 * jax.random.normal(next(keys), (emb_dim,), jnp.float32),
            "bn2_v": jnp.abs(1.0 + 0.1 * jax.random.normal(next(keys), (emb_dim,), jnp.float32)),
        }
        params["layers"].append(lp)
    params["wp"] = 0.1 * jax.random.normal(next(keys), (emb_dim, num_tasks), jnp.float32)
    params["bp"] = 0.1 * jax.random.normal(next(keys), (num_tasks,), jnp.float32)
    return params


if __name__ == "__main__":
    EMB_DIM = 32       # emb_dim
    NUM_LAYERS = 2     # num_layers (module requires >= 2)
    NUM_TASKS = 16     # num_tasks
    NUM_GRAPHS = 4     # graphs in the batch
    NODES_PER_G = 8
    N = NUM_GRAPHS * NODES_PER_G        # 32 nodes total
    EDGES_PER_G = 16

    key = jax.random.PRNGKey(0)
    kp, kx, ks, kd = jax.random.split(key, 4)

    params = make_params(kp, EMB_DIM, NUM_LAYERS, NUM_TASKS)

    # node categorical features for the SBM encoder (Embedding(8, emb_dim))
    x_idx = jax.random.randint(kx, (N,), 0, 8)

    # batch vector (graph assignment) and synthetic intra-graph edges
    batch = jnp.repeat(jnp.arange(NUM_GRAPHS), NODES_PER_G)
    gid = jnp.repeat(jnp.arange(NUM_GRAPHS), EDGES_PER_G)
    src = jax.random.randint(ks, (NUM_GRAPHS * EDGES_PER_G,), 0, NODES_PER_G) + gid * NODES_PER_G
    dst = jax.random.randint(kd, (NUM_GRAPHS * EDGES_PER_G,), 0, NODES_PER_G) + gid * NODES_PER_G

    # dense adjacency with sum-aggregation semantics: A[i, j] = #edges j -> i
    adj = jnp.zeros((N, N), jnp.float32).at[dst, src].add(1.0)

    # mean-pool matrix P[g, n] = 1/|V_g| if batch[n] == g
    onehot = (batch[None, :] == jnp.arange(NUM_GRAPHS)[:, None]).astype(jnp.float32)
    pool_mat = onehot / jnp.sum(onehot, axis=1, keepdims=True)

    MATMUL_DTYPE = jnp.bfloat16   # default per perf review; use jnp.float32 for tight numerics
    out = gnn_forward(params, x_idx, adj, pool_mat, matmul_dtype=MATMUL_DTYPE)
    out = jax.block_until_ready(out)

    ref = gnn_reference(params, x_idx, adj, pool_mat)
    tol = 2e-2 if jnp.dtype(MATMUL_DTYPE) == jnp.dtype(jnp.bfloat16) else 5e-3
    assert out.shape == (NUM_GRAPHS, NUM_TASKS)
    assert bool(jnp.all(jnp.isfinite(out)))
    assert bool(jnp.allclose(out, ref, atol=tol, rtol=tol)), \
        float(jnp.max(jnp.abs(out - ref)))
    print("KERNEL_OK")
</pallas_src>

<mosaic_0001>
module attributes {stable_mosaic.version = 11 : i64} {
  func.func @fused_gnn_kernel(%arg0: i32, %arg1: memref<1x1x128xf32, #tpu.memory_space<vmem>>, %arg2: memref<1x128x128xbf16, #tpu.memory_space<vmem>>, %arg3: memref<1x1x128xf32, #tpu.memory_space<vmem>>, %arg4: memref<1x128x128xbf16, #tpu.memory_space<vmem>>, %arg5: memref<1x1x128xf32, #tpu.memory_space<vmem>>, %arg6: memref<128x128xbf16, #tpu.memory_space<vmem>>, %arg7: memref<16x128xbf16, #tpu.memory_space<vmem>>, %arg8: memref<128x128xbf16, #tpu.memory_space<vmem>>, %arg9: memref<1x128xf32, #tpu.memory_space<vmem>>, %arg10: memref<128x128xf32, #tpu.memory_space<any>>, %arg11: memref<16x128xf32, #tpu.memory_space<vmem>>, %arg12: memref<128x128xf32, #tpu.memory_space<vmem>>, %arg13: memref<!tpu.dma_semaphore, #tpu.memory_space<semaphore_mem>>) attributes {dimension_semantics = [#tpu.dimension_semantics<arbitrary>], iteration_bounds = array<i64: 2>, scalar_prefetch = 0 : i64, scratch_operands = 2 : i64, tpu.core_type = #tpu.core_type<tc>, window_params = [{transform_indices = @transform_0, window_bounds = array<i64: 1, 1, 128>}, {transform_indices = @transform_1, window_bounds = array<i64: 1, 128, 128>}, {transform_indices = @transform_2, window_bounds = array<i64: 1, 1, 128>}, {transform_indices = @transform_3, window_bounds = array<i64: 1, 128, 128>}, {transform_indices = @transform_4, window_bounds = array<i64: 1, 1, 128>}, {pipeline_mode = #tpu.pipeline_mode<synchronous>, transform_indices = @transform_5, window_bounds = array<i64: 128, 128>}, {pipeline_mode = #tpu.pipeline_mode<synchronous>, transform_indices = @transform_6, window_bounds = array<i64: 16, 128>}, {pipeline_mode = #tpu.pipeline_mode<synchronous>, transform_indices = @transform_7, window_bounds = array<i64: 128, 128>}, {pipeline_mode = #tpu.pipeline_mode<synchronous>, transform_indices = @transform_8, window_bounds = array<i64: 1, 128>}, {}, {pipeline_mode = #tpu.pipeline_mode<synchronous>, transform_indices = @transform_10, window_bounds = array<i64: 16, 128>}]} {
    %c0_i32 = arith.constant 0 : i32
    %0 = arith.cmpi eq, %arg0, %c0_i32 : i32
    %1 = arith.extui %0 : i1 to i32
    %c0_i32_0 = arith.constant 0 : i32
    %2 = arith.cmpi ne, %1, %c0_i32_0 : i32
    scf.if %2 {
      tpu.enqueue_dma source(%arg10 : memref<128x128xf32, #tpu.memory_space<any>>) target(%arg12 : memref<128x128xf32, #tpu.memory_space<vmem>>) target_semaphore(%arg13 : memref<!tpu.dma_semaphore, #tpu.memory_space<semaphore_mem>>)
      tpu.wait_dma2 semaphore(%arg13 : memref<!tpu.dma_semaphore, #tpu.memory_space<semaphore_mem>>) src(%arg10 : memref<128x128xf32, #tpu.memory_space<any>>) dst(%arg12 : memref<128x128xf32, #tpu.memory_space<vmem>>)
    } else {
    }
    %c0 = arith.constant 0 : index
    %c0_1 = arith.constant 0 : index
    %3 = vector.load %arg12[%c0, %c0_1] : memref<128x128xf32, #tpu.memory_space<vmem>>, vector<128x128xf32>
    %c0_2 = arith.constant 0 : index
    %c0_3 = arith.constant 0 : index
    %4 = vector.load %arg6[%c0_2, %c0_3] : memref<128x128xbf16, #tpu.memory_space<vmem>>, vector<128x128xbf16>
    %5 = arith.truncf %3 : vector<128x128xf32> to vector<128x128xbf16>
    %cst = arith.constant dense<0.000000e+00> : vector<128x128xf32>
    %6 = tpu.matmul %4, %5, %cst {dimension_numbers = #tpu.dot_dimension_numbers<[1], [0], [0], [1], [0, 0, 1, 1], [], []>} : vector<128x128xbf16>, vector<128x128xbf16>, vector<128x128xf32> -> vector<128x128xf32>
    %c0_4 = arith.constant 0 : index
    %c0_5 = arith.constant 0 : index
    %c0_6 = arith.constant 0 : index
    %7 = vector.load %arg1[%c0_4, %c0_5, %c0_6] : memref<1x1x128xf32, #tpu.memory_space<vmem>>, vector<1x1x128xf32>
    %8 = vector.shape_cast %7 : vector<1x1x128xf32> to vector<1x128xf32>
    %9 = vector.broadcast %8 : vector<1x128xf32> to vector<128x128xf32>
    %10 = arith.mulf %9, %3 : vector<128x128xf32>
    %11 = arith.addf %10, %6 : vector<128x128xf32>
    %12 = arith.truncf %11 : vector<128x128xf32> to vector<128x128xbf16>
    %c0_7 = arith.constant 0 : index
    %c0_8 = arith.constant 0 : index
    %c0_9 = arith.constant 0 : index
    %13 = vector.load %arg2[%c0_7, %c0_8, %c0_9] : memref<1x128x128xbf16, #tpu.memory_space<vmem>>, vector<1x128x128xbf16>
    %14 = vector.shape_cast %13 : vector<1x128x128xbf16> to vector<128x128xbf16>
    %cst_10 = arith.constant dense<0.000000e+00> : vector<128x128xf32>
    %15 = tpu.matmul %12, %14, %cst_10 {dimension_numbers = #tpu.dot_dimension_numbers<[1], [0], [0], [1], [0, 0, 1, 1], [], []>} : vector<128x128xbf16>, vector<128x128xbf16>, vector<128x128xf32> -> vector<128x128xf32>
    %c0_11 = arith.constant 0 : index
    %c0_12 = arith.constant 0 : index
    %c0_13 = arith.constant 0 : index
    %16 = vector.load %arg3[%c0_11, %c0_12, %c0_13] : memref<1x1x128xf32, #tpu.memory_space<vmem>>, vector<1x1x128xf32>
    %17 = vector.shape_cast %16 : vector<1x1x128xf32> to vector<1x128xf32>
    %18 = vector.broadcast %17 : vector<1x128xf32> to vector<128x128xf32>
    %19 = arith.addf %15, %18 : vector<128x128xf32>
    %cst_14 = arith.constant 0.000000e+00 : f32
    %20 = vector.broadcast %cst_14 : f32 to vector<128x128xf32>
    %21 = arith.maximumf %19, %20 : vector<128x128xf32>
    %22 = arith.truncf %21 : vector<128x128xf32> to vector<128x128xbf16>
    %c0_15 = arith.constant 0 : index
    %c0_16 = arith.constant 0 : index
    %c0_17 = arith.constant 0 : index
    %23 = vector.load %arg4[%c0_15, %c0_16, %c0_17] : memref<1x128x128xbf16, #tpu.memory_space<vmem>>, vector<1x128x128xbf16>
    %24 = vector.shape_cast %23 : vector<1x128x128xbf16> to vector<128x128xbf16>
    %cst_18 = arith.constant dense<0.000000e+00> : vector<128x128xf32>
    %25 = tpu.matmul %22, %24, %cst_18 {dimension_numbers = #tpu.dot_dimension_numbers<[1], [0], [0], [1], [0, 0, 1, 1], [], []>} : vector<128x128xbf16>, vector<128x128xbf16>, vector<128x128xf32> -> vector<128x128xf32>
    %c0_19 = arith.constant 0 : index
    %c0_20 = arith.constant 0 : index
    %c0_21 = arith.constant 0 : index
    %26 = vector.load %arg5[%c0_19, %c0_20, %c0_21] : memref<1x1x128xf32, #tpu.memory_space<vmem>>, vector<1x1x128xf32>
    %27 = vector.shape_cast %26 : vector<1x1x128xf32> to vector<1x128xf32>
    %28 = vector.broadcast %27 : vector<1x128xf32> to vector<128x128xf32>
    %29 = arith.addf %25, %28 : vector<128x128xf32>
    %c0_22 = arith.constant 0 : index
    %c0_23 = arith.constant 0 : index
    %30 = vector.load %arg12[%c0_22, %c0_23] : memref<128x128xf32, #tpu.memory_space<vmem>>, vector<128x128xf32>
    tpu.vector_store %arg12[%c0_22, %c0_23], %29 {strides = array<i32>} : memref<128x128xf32, #tpu.memory_space<vmem>>, vector<128x128xf32>,
    %c1_i32 = arith.constant 1 : i32
    %31 = arith.cmpi slt, %arg0, %c1_i32 : i32
    %32 = arith.extui %31 : i1 to i32
    %c0_i32_24 = arith.constant 0 : i32
    %33 = arith.cmpi ne, %32, %c0_i32_24 : i32
    scf.if %33 {
      %c0_27 = arith.constant 0 : index
      %c0_28 = arith.constant 0 : index
      %37 = vector.load %arg12[%c0_27, %c0_28] : memref<128x128xf32, #tpu.memory_space<vmem>>, vector<128x128xf32>
      %cst_29 = arith.constant 0.000000e+00 : f32
      %38 = vector.broadcast %cst_29 : f32 to vector<128x128xf32>
      %39 = arith.maximumf %37, %38 : vector<128x128xf32>
      %c0_30 = arith.constant 0 : index
      %c0_31 = arith.constant 0 : index
      %40 = vector.load %arg12[%c0_30, %c0_31] : memref<128x128xf32, #tpu.memory_space<vmem>>, vector<128x128xf32>
      tpu.vector_store %arg12[%c0_30, %c0_31], %39 {strides = array<i32>} : memref<128x128xf32, #tpu.memory_space<vmem>>, vector<128x128xf32>,
    } else {
    }
    %c1_i32_25 = arith.constant 1 : i32
    %34 = arith.cmpi eq, %arg0, %c1_i32_25 : i32
    %35 = arith.extui %34 : i1 to i32
    %c0_i32_26 = arith.constant 0 : i32
    %36 = arith.cmpi ne, %35, %c0_i32_26 : i32
    scf.if %36 {
      %c0_27 = arith.constant 0 : index
      %c0_28 = arith.constant 0 : index
      %37 = vector.load %arg7[%c0_27, %c0_28] : memref<16x128xbf16, #tpu.memory_space<vmem>>, vector<16x128xbf16>
      %38 = arith.truncf %29 : vector<128x128xf32> to vector<128x128xbf16>
      %cst_29 = arith.constant dense<0.000000e+00> : vector<16x128xf32>
      %39 = tpu.matmul %37, %38, %cst_29 {dimension_numbers = #tpu.dot_dimension_numbers<[1], [0], [0], [1], [0, 0, 1, 1], [], []>} : vector<16x128xbf16>, vector<128x128xbf16>, vector<16x128xf32> -> vector<16x128xf32>
      %40 = arith.truncf %39 : vector<16x128xf32> to vector<16x128xbf16>
      %c0_30 = arith.constant 0 : index
      %c0_31 = arith.constant 0 : index
      %41 = vector.load %arg8[%c0_30, %c0_31] : memref<128x128xbf16, #tpu.memory_space<vmem>>, vector<128x128xbf16>
      %cst_32 = arith.constant dense<0.000000e+00> : vector<16x128xf32>
      %42 = tpu.matmul %40, %41, %cst_32 {dimension_numbers = #tpu.dot_dimension_numbers<[1], [0], [0], [1], [0, 0, 1, 1], [], []>} : vector<16x128xbf16>, vector<128x128xbf16>, vector<16x128xf32> -> vector<16x128xf32>
      %c0_33 = arith.constant 0 : index
      %c0_34 = arith.constant 0 : index
      %43 = vector.load %arg9[%c0_33, %c0_34] : memref<1x128xf32, #tpu.memory_space<vmem>>, vector<1x128xf32>
      %44 = vector.broadcast %43 : vector<1x128xf32> to vector<16x128xf32>
      %45 = arith.addf %42, %44 : vector<16x128xf32>
      %c0_35 = arith.constant 0 : index
      %c0_36 = arith.constant 0 : index
      %46 = vector.load %arg11[%c0_35, %c0_36] : memref<16x128xf32, #tpu.memory_space<vmem>>, vector<16x128xf32>
      tpu.vector_store %arg11[%c0_35, %c0_36], %45 {strides = array<i32>} : memref<16x128xf32, #tpu.memory_space<vmem>>, vector<16x128xf32>,
    } else {
    }
    return
  }
  func.func @transform_0(%arg0: i32) -> (i32, i32, i32) {
    %c0_i32 = arith.constant 0 : i32
    %c0_i32_0 = arith.constant 0 : i32
    %c0_i32_1 = arith.constant 0 : i32
    return %arg0, %c0_i32, %c0_i32_0 : i32, i32, i32
  }
  func.func @transform_1(%arg0: i32) -> (i32, i32, i32) {
    %c0_i32 = arith.constant 0 : i32
    %c0_i32_0 = arith.constant 0 : i32
    %c0_i32_1 = arith.constant 0 : i32
    return %arg0, %c0_i32, %c0_i32_0 : i32, i32, i32
  }
  func.func @transform_2(%arg0: i32) -> (i32, i32, i32) {
    %c0_i32 = arith.constant 0 : i32
    %c0_i32_0 = arith.constant 0 : i32
    %c0_i32_1 = arith.constant 0 : i32
    return %arg0, %c0_i32, %c0_i32_0 : i32, i32, i32
  }
  func.func @transform_3(%arg0: i32) -> (i32, i32, i32) {
    %c0_i32 = arith.constant 0 : i32
    %c0_i32_0 = arith.constant 0 : i32
    %c0_i32_1 = arith.constant 0 : i32
    return %arg0, %c0_i32, %c0_i32_0 : i32, i32, i32
  }
  func.func @transform_4(%arg0: i32) -> (i32, i32, i32) {
    %c0_i32 = arith.constant 0 : i32
    %c0_i32_0 = arith.constant 0 : i32
    %c0_i32_1 = arith.constant 0 : i32
    return %arg0, %c0_i32, %c0_i32_0 : i32, i32, i32
  }
  func.func @transform_5(%arg0: i32) -> (i32, i32) {
    %c0_i32 = arith.constant 0 : i32
    %c0_i32_0 = arith.constant 0 : i32
    %c0_i32_1 = arith.constant 0 : i32
    return %c0_i32, %c0_i32_0 : i32, i32
  }
  func.func @transform_6(%arg0: i32) -> (i32, i32) {
    %c0_i32 = arith.constant 0 : i32
    %c0_i32_0 = arith.constant 0 : i32
    %c0_i32_1 = arith.constant 0 : i32
    return %c0_i32, %c0_i32_0 : i32, i32
  }
  func.func @transform_7(%arg0: i32) -> (i32, i32) {
    %c0_i32 = arith.constant 0 : i32
    %c0_i32_0 = arith.constant 0 : i32
    %c0_i32_1 = arith.constant 0 : i32
    return %c0_i32, %c0_i32_0 : i32, i32
  }
  func.func @transform_8(%arg0: i32) -> (i32, i32) {
    %c0_i32 = arith.constant 0 : i32
    %c0_i32_0 = arith.constant 0 : i32
    %c0_i32_1 = arith.constant 0 : i32
    return %c0_i32, %c0_i32_0 : i32, i32
  }
  func.func @transform_10(%arg0: i32) -> (i32, i32) {
    %c0_i32 = arith.constant 0 : i32
    %c0_i32_0 = arith.constant 0 : i32
    %c0_i32_1 = arith.constant 0 : i32
    return %c0_i32, %c0_i32_0 : i32, i32
  }
}

module attributes {stable_mosaic.version = 11 : i64} {
  func.func @fused_gnn_kernel(%arg0: i32, %arg1: memref<1x1x128xf32, #tpu.memory_space<vmem>>, %arg2: memref<1x128x128xbf16, #tpu.memory_space<vmem>>, %arg3: memref<1x1x128xf32, #tpu.memory_space<vmem>>, %arg4: memref<1x128x128xbf16, #tpu.memory_space<vmem>>, %arg5: memref<1x1x128xf32, #tpu.memory_space<vmem>>, %arg6: memref<128x128xbf16, #tpu.memory_space<vmem>>, %arg7: memref<16x128xbf16, #tpu.memory_space<vmem>>, %arg8: memref<128x128xbf16, #tpu.memory_space<vmem>>, %arg9: memref<1x128xf32, #tpu.memory_space<vmem>>, %arg10: memref<128x128xf32, #tpu.memory_space<any>>, %arg11: memref<16x128xf32, #tpu.memory_space<vmem>>, %arg12: memref<128x128xf32, #tpu.memory_space<vmem>>, %arg13: memref<!tpu.dma_semaphore, #tpu.memory_space<semaphore_mem>>) attributes {dimension_semantics = [#tpu.dimension_semantics<arbitrary>], iteration_bounds = array<i64: 2>, scalar_prefetch = 0 : i64, scratch_operands = 2 : i64, tpu.core_type = #tpu.core_type<tc>, window_params = [{transform_indices = @transform_0, window_bounds = array<i64: 1, 1, 128>}, {transform_indices = @transform_1, window_bounds = array<i64: 1, 128, 128>}, {transform_indices = @transform_2, window_bounds = array<i64: 1, 1, 128>}, {transform_indices = @transform_3, window_bounds = array<i64: 1, 128, 128>}, {transform_indices = @transform_4, window_bounds = array<i64: 1, 1, 128>}, {pipeline_mode = #tpu.pipeline_mode<synchronous>, transform_indices = @transform_5, window_bounds = array<i64: 128, 128>}, {pipeline_mode = #tpu.pipeline_mode<synchronous>, transform_indices = @transform_6, window_bounds = array<i64: 16, 128>}, {pipeline_mode = #tpu.pipeline_mode<synchronous>, transform_indices = @transform_7, window_bounds = array<i64: 128, 128>}, {pipeline_mode = #tpu.pipeline_mode<synchronous>, transform_indices = @transform_8, window_bounds = array<i64: 1, 128>}, {}, {pipeline_mode = #tpu.pipeline_mode<synchronous>, transform_indices = @transform_10, window_bounds = array<i64: 16, 128>}]} {
    %c0_i32 = arith.constant 0 : i32
    %0 = arith.cmpi eq, %arg0, %c0_i32 : i32
    %1 = arith.extui %0 : i1 to i32
    %c0_i32_0 = arith.constant 0 : i32
    %2 = arith.cmpi ne, %1, %c0_i32_0 : i32
    scf.if %2 {
      tpu.enqueue_dma source(%arg10 : memref<128x128xf32, #tpu.memory_space<any>>) target(%arg12 : memref<128x128xf32, #tpu.memory_space<vmem>>) target_semaphore(%arg13 : memref<!tpu.dma_semaphore, #tpu.memory_space<semaphore_mem>>)
      tpu.wait_dma2 semaphore(%arg13 : memref<!tpu.dma_semaphore, #tpu.memory_space<semaphore_mem>>) src(%arg10 : memref<128x128xf32, #tpu.memory_space<any>>) dst(%arg12 : memref<128x128xf32, #tpu.memory_space<vmem>>)
    } else {
    }
    %c0 = arith.constant 0 : index
    %c0_1 = arith.constant 0 : index
    %3 = vector.load %arg12[%c0, %c0_1] : memref<128x128xf32, #tpu.memory_space<vmem>>, vector<128x128xf32>
    %c0_2 = arith.constant 0 : index
    %c0_3 = arith.constant 0 : index
    %4 = vector.load %arg6[%c0_2, %c0_3] : memref<128x128xbf16, #tpu.memory_space<vmem>>, vector<128x128xbf16>
    %5 = arith.truncf %3 : vector<128x128xf32> to vector<128x128xbf16>
    %cst = arith.constant dense<0.000000e+00> : vector<128x128xf32>
    %6 = tpu.matmul %4, %5, %cst {dimension_numbers = #tpu.dot_dimension_numbers<[1], [0], [0], [1], [0, 0, 1, 1], [], []>} : vector<128x128xbf16>, vector<128x128xbf16>, vector<128x128xf32> -> vector<128x128xf32>
    %c0_4 = arith.constant 0 : index
    %c0_5 = arith.constant 0 : index
    %c0_6 = arith.constant 0 : index
    %7 = vector.load %arg1[%c0_4, %c0_5, %c0_6] : memref<1x1x128xf32, #tpu.memory_space<vmem>>, vector<1x1x128xf32>
    %8 = vector.shape_cast %7 : vector<1x1x128xf32> to vector<1x128xf32>
    %9 = vector.broadcast %8 : vector<1x128xf32> to vector<128x128xf32>
    %10 = arith.mulf %9, %3 : vector<128x128xf32>
    %11 = arith.addf %10, %6 : vector<128x128xf32>
    %12 = arith.truncf %11 : vector<128x128xf32> to vector<128x128xbf16>
    %c0_7 = arith.constant 0 : index
    %c0_8 = arith.constant 0 : index
    %c0_9 = arith.constant 0 : index
    %13 = vector.load %arg2[%c0_7, %c0_8, %c0_9] : memref<1x128x128xbf16, #tpu.memory_space<vmem>>, vector<1x128x128xbf16>
    %14 = vector.shape_cast %13 : vector<1x128x128xbf16> to vector<128x128xbf16>
    %cst_10 = arith.constant dense<0.000000e+00> : vector<128x128xf32>
    %15 = tpu.matmul %12, %14, %cst_10 {dimension_numbers = #tpu.dot_dimension_numbers<[1], [0], [0], [1], [0, 0, 1, 1], [], []>} : vector<128x128xbf16>, vector<128x128xbf16>, vector<128x128xf32> -> vector<128x128xf32>
    %c0_11 = arith.constant 0 : index
    %c0_12 = arith.constant 0 : index
    %c0_13 = arith.constant 0 : index
    %16 = vector.load %arg3[%c0_11, %c0_12, %c0_13] : memref<1x1x128xf32, #tpu.memory_space<vmem>>, vector<1x1x128xf32>
    %17 = vector.shape_cast %16 : vector<1x1x128xf32> to vector<1x128xf32>
    %18 = vector.broadcast %17 : vector<1x128xf32> to vector<128x128xf32>
    %19 = arith.addf %15, %18 : vector<128x128xf32>
    %cst_14 = arith.constant 0.000000e+00 : f32
    %20 = vector.broadcast %cst_14 : f32 to vector<128x128xf32>
    %21 = arith.maximumf %19, %20 : vector<128x128xf32>
    %22 = arith.truncf %21 : vector<128x128xf32> to vector<128x128xbf16>
    %c0_15 = arith.constant 0 : index
    %c0_16 = arith.constant 0 : index
    %c0_17 = arith.constant 0 : index
    %23 = vector.load %arg4[%c0_15, %c0_16, %c0_17] : memref<1x128x128xbf16, #tpu.memory_space<vmem>>, vector<1x128x128xbf16>
    %24 = vector.shape_cast %23 : vector<1x128x128xbf16> to vector<128x128xbf16>
    %cst_18 = arith.constant dense<0.000000e+00> : vector<128x128xf32>
    %25 = tpu.matmul %22, %24, %cst_18 {dimension_numbers = #tpu.dot_dimension_numbers<[1], [0], [0], [1], [0, 0, 1, 1], [], []>} : vector<128x128xbf16>, vector<128x128xbf16>, vector<128x128xf32> -> vector<128x128xf32>
    %c0_19 = arith.constant 0 : index
    %c0_20 = arith.constant 0 : index
    %c0_21 = arith.constant 0 : index
    %26 = vector.load %arg5[%c0_19, %c0_20, %c0_21] : memref<1x1x128xf32, #tpu.memory_space<vmem>>, vector<1x1x128xf32>
    %27 = vector.shape_cast %26 : vector<1x1x128xf32> to vector<1x128xf32>
    %28 = vector.broadcast %27 : vector<1x128xf32> to vector<128x128xf32>
    %29 = arith.addf %25, %28 : vector<128x128xf32>
    %c0_22 = arith.constant 0 : index
    %c0_23 = arith.constant 0 : index
    %30 = vector.load %arg12[%c0_22, %c0_23] : memref<128x128xf32, #tpu.memory_space<vmem>>, vector<128x128xf32>
    tpu.vector_store %arg12[%c0_22, %c0_23], %29 {strides = array<i32>} : memref<128x128xf32, #tpu.memory_space<vmem>>, vector<128x128xf32>,
    %c1_i32 = arith.constant 1 : i32
    %31 = arith.cmpi slt, %arg0, %c1_i32 : i32
    %32 = arith.extui %31 : i1 to i32
    %c0_i32_24 = arith.constant 0 : i32
    %33 = arith.cmpi ne, %32, %c0_i32_24 : i32
    scf.if %33 {
      %c0_27 = arith.constant 0 : index
      %c0_28 = arith.constant 0 : index
      %37 = vector.load %arg12[%c0_27, %c0_28] : memref<128x128xf32, #tpu.memory_space<vmem>>, vector<128x128xf32>
      %cst_29 = arith.constant 0.000000e+00 : f32
      %38 = vector.broadcast %cst_29 : f32 to vector<128x128xf32>
      %39 = arith.maximumf %37, %38 : vector<128x128xf32>
      %c0_30 = arith.constant 0 : index
      %c0_31 = arith.constant 0 : index
      %40 = vector.load %arg12[%c0_30, %c0_31] : memref<128x128xf32, #tpu.memory_space<vmem>>, vector<128x128xf32>
      tpu.vector_store %arg12[%c0_30, %c0_31], %39 {strides = array<i32>} : memref<128x128xf32, #tpu.memory_space<vmem>>, vector<128x128xf32>,
    } else {
    }
    %c1_i32_25 = arith.constant 1 : i32
    %34 = arith.cmpi eq, %arg0, %c1_i32_25 : i32
    %35 = arith.extui %34 : i1 to i32
    %c0_i32_26 = arith.constant 0 : i32
    %36 = arith.cmpi ne, %35, %c0_i32_26 : i32
    scf.if %36 {
      %c0_27 = arith.constant 0 : index
      %c0_28 = arith.constant 0 : index
      %37 = vector.load %arg7[%c0_27, %c0_28] : memref<16x128xbf16, #tpu.memory_space<vmem>>, vector<16x128xbf16>
      %38 = arith.truncf %29 : vector<128x128xf32> to vector<128x128xbf16>
      %cst_29 = arith.constant dense<0.000000e+00> : vector<16x128xf32>
      %39 = tpu.matmul %37, %38, %cst_29 {dimension_numbers = #tpu.dot_dimension_numbers<[1], [0], [0], [1], [0, 0, 1, 1], [], []>} : vector<16x128xbf16>, vector<128x128xbf16>, vector<16x128xf32> -> vector<16x128xf32>
      %40 = arith.truncf %39 : vector<16x128xf32> to vector<16x128xbf16>
      %c0_30 = arith.constant 0 : index
      %c0_31 = arith.constant 0 : index
      %41 = vector.load %arg8[%c0_30, %c0_31] : memref<128x128xbf16, #tpu.memory_space<vmem>>, vector<128x128xbf16>
      %cst_32 = arith.constant dense<0.000000e+00> : vector<16x128xf32>
      %42 = tpu.matmul %40, %41, %cst_32 {dimension_numbers = #tpu.dot_dimension_numbers<[1], [0], [0], [1], [0, 0, 1, 1], [], []>} : vector<16x128xbf16>, vector<128x128xbf16>, vector<16x128xf32> -> vector<16x128xf32>
      %c0_33 = arith.constant 0 : index
      %c0_34 = arith.constant 0 : index
      %43 = vector.load %arg9[%c0_33, %c0_34] : memref<1x128xf32, #tpu.memory_space<vmem>>, vector<1x128xf32>
      %44 = vector.broadcast %43 : vector<1x128xf32> to vector<16x128xf32>
      %45 = arith.addf %42, %44 : vector<16x128xf32>
      %c0_35 = arith.constant 0 : index
      %c0_36 = arith.constant 0 : index
      %46 = vector.load %arg11[%c0_35, %c0_36] : memref<16x128xf32, #tpu.memory_space<vmem>>, vector<16x128xf32>
      tpu.vector_store %arg11[%c0_35, %c0_36], %45 {strides = array<i32>} : memref<16x128xf32, #tpu.memory_space<vmem>>, vector<16x128xf32>,
    } else {
    }
    return
  }
  func.func @transform_0(%arg0: i32) -> (i32, i32, i32) {
    %c0_i32 = arith.constant 0 : i32
    %c0_i32_0 = arith.constant 0 : i32
    %c0_i32_1 = arith.constant 0 : i32
    return %arg0, %c0_i32, %c0_i32_0 : i32, i32, i32
  }
  func.func @transform_1(%arg0: i32) -> (i32, i32, i32) {
    %c0_i32 = arith.constant 0 : i32
    %c0_i32_0 = arith.constant 0 : i32
    %c0_i32_1 = arith.constant 0 : i32
    return %arg0, %c0_i32, %c0_i32_0 : i32, i32, i32
  }
  func.func @transform_2(%arg0: i32) -> (i32, i32, i32) {
    %c0_i32 = arith.constant 0 : i32
    %c0_i32_0 = arith.constant 0 : i32
    %c0_i32_1 = arith.constant 0 : i32
    return %arg0, %c0_i32, %c0_i32_0 : i32, i32, i32
  }
  func.func @transform_3(%arg0: i32) -> (i32, i32, i32) {
    %c0_i32 = arith.constant 0 : i32
    %c0_i32_0 = arith.constant 0 : i32
    %c0_i32_1 = arith.constant 0 : i32
    return %arg0, %c0_i32, %c0_i32_0 : i32, i32, i32
  }
  func.func @transform_4(%arg0: i32) -> (i32, i32, i32) {
    %c0_i32 = arith.constant 0 : i32
    %c0_i32_0 = arith.constant 0 : i32
    %c0_i32_1 = arith.constant 0 : i32
    return %arg0, %c0_i32, %c0_i32_0 : i32, i32, i32
  }
  func.func @transform_5(%arg0: i32) -> (i32, i32) {
    %c0_i32 = arith.constant 0 : i32
    %c0_i32_0 = arith.constant 0 : i32
    %c0_i32_1 = arith.constant 0 : i32
    return %c0_i32, %c0_i32_0 : i32, i32
  }
  func.func @transform_6(%arg0: i32) -> (i32, i32) {
    %c0_i32 = arith.constant 0 : i32
    %c0_i32_0 = arith.constant 0 : i32
    %c0_i32_1 = arith.constant 0 : i32
    return %c0_i32, %c0_i32_0 : i32, i32
  }
  func.func @transform_7(%arg0: i32) -> (i32, i32) {
    %c0_i32 = arith.constant 0 : i32
    %c0_i32_0 = arith.constant 0 : i32
    %c0_i32_1 = arith.constant 0 : i32
    return %c0_i32, %c0_i32_0 : i32, i32
  }
  func.func @transform_8(%arg0: i32) -> (i32, i32) {
    %c0_i32 = arith.constant 0 : i32
    %c0_i32_0 = arith.constant 0 : i32
    %c0_i32_1 = arith.constant 0 : i32
    return %c0_i32, %c0_i32_0 : i32, i32
  }
  func.func @transform_10(%arg0: i32) -> (i32, i32) {
    %c0_i32 = arith.constant 0 : i32
    %c0_i32_0 = arith.constant 0 : i32
    %c0_i32_1 = arith.constant 0 : i32
    return %c0_i32, %c0_i32_0 : i32, i32
  }
}

</mosaic_0001>

<bundles_post_ra>
// kernel: tpu_custom_call.1
= control target key start
LH: loop header
LB: loop body
LE: loop exit
PB: predicated region body
PF: predicated region fallthrough
CT: control target
= control target key end

     0   :  { %s2686_s0 = inlined_call_operand.hbm [shape: f32[2,1,128], index: 0, kind: input, shape index: {}]   ;;  %s2687_s1 = inlined_call_operand.hbm [shape: bf16[2,128,128], index: 1, kind: input, shape index: {}]   ;;  %s2688_s2 = inlined_call_operand.vmem [shape: f32[2,1,128], index: 2, kind: input, shape index: {}]   ;;  %s2689_s3 = inlined_call_operand.hbm [shape: bf16[2,128,128], index: 3, kind: input, shape index: {}]   ;;  %s2690_s4 = inlined_call_operand.vmem [shape: f32[2,1,128], index: 4, kind: input, shape index: {}]   ;;  %s2691_s5 = inlined_call_operand.hbm [shape: bf16[128,128], index: 5, kind: input, shape index: {}]   ;;  %s2692_s6 = inlined_call_operand.vmem [shape: bf16[16,128], index: 6, kind: input, shape index: {}]   ;;  %s2693_s7 = inlined_call_operand.hbm [shape: bf16[128,128], index: 7, kind: input, shape index: {}]   ;;  %s2694_s8 = inlined_call_operand.vmem [shape: f32[1,128], index: 8, kind: input, shape index: {}]   ;;  %s2695_s9 = inlined_call_operand.hbm [shape: f32[128,128], index: 9, kind: input, shape index: {}]   ;;  %s2696_s10 = inlined_call_operand.hbm [shape: f32[16,128], index: 10, kind: output, shape index: {}]  }
   0x1   :  { %2712 = sst [smem:[#allocation26_spill]] %s2687_s1 }
   0x2   :  { %2713 = sst [smem:[#allocation27_spill]] %s2691_s5 }
   0x3   :  { %2714 = sst [smem:[#allocation28_spill]] %s2692_s6 }
   0x4   :  { %2715 = sst [smem:[#allocation29_spill]] %s2694_s8 }
   0x5   :  { %2716 = sst [smem:[#allocation30_spill]] %s2696_s10 }
   0x6   :  { %15 = vsyncpa [#allocation5], 0 }
   0x7   :  { %17 = vsyncpa [#allocation5 + $0x1], 0 }
   0x8   :  { %18 = vsyncpa [#allocation8], 0 }
   0x9   :  { %20 = vsyncpa [#allocation8 + $0x1], 0 }
   0xa   :  { %21 = vsyncpa [#allocation11], 0 }
   0xb   :  { %22 = vsyncpa [#allocation6], 0  ;;  %s2186_s13 = smov 0   ;;  %s2188_s14 = smov 0  }
   0xc   :  { %s2190_s15 = smov 0   ;;  %s2192_s16 = smov 0  }
   0xd LB: > { %2717 = sst [smem:[#allocation23_spill]] %s2112_s15  ;;  %s2205_s17 = sadd.s32 4294967295, %s2116_s16   ;;  %s2116_s16 = sphi %s2192_s16, %s2748_s16   ;;  %s2112_s15 = sphi %s2190_s15, %s2750_s15   ;;  %s2108_s14 = sphi %s2188_s14, %s2752_s14   ;;  %s2104_s13 = sphi %s2186_s13, %s2751_s13  }
   0xe   : > { %s2208_s18 = sadd.s32 1, %s2116_s16   ;;  %s35_s20 = sadd.s32 1, %s2112_s15 }
   0xf   : > { %2718 = sst [smem:[#allocation24_spill]] %s2208_s18  ;;  %s32_s19 = ssub.s32 %s2116_s16, %s2208_s18 }
  0x10   : > { %p33_p0 = scmp.eq.s32.totalorder %s32_s19, 0  ;;  %p42_p1 = scmp.ne.s32.totalorder %s2112_s15, %s2108_s14 }
  0x11   : > { %p43_p2 = scmp.eq.s32.totalorder %s2116_s16, 0  ;;  %p48_p3 = scmp.ne.s32.totalorder %s2108_s14, %s2104_s13 }
  0x12   : > { %s2218_s21 = scalar_select %p33_p0, %s2112_s15, %s35_s20  }
  0x13   : > { %p2220_p4 = por %p43_p2, %p42_p1  ;;  %p2697_p5 = scmp.eq.s32.totalorder %s2205_s17, 0 }
  0x14   : > { %2719 = sst [smem:[#allocation25_spill]] %s2218_s21  ;;  %p1466_p6 = scmp.ge.s32.totalorder %s2116_s16, 1 }
  0x15   : > { %p268_p7 = scmp.lt.s32.totalorder %s2116_s16, 3  ;;  %p2229_p8 = por %p2697_p5, %p48_p3 }
  0x16   : > { %s2118_s25 = smov [#allocation10]   ;;  %p1787_p12 = scmp.lt.s32.totalorder %s2116_s16, 2 }
  0x17   : > { %s2721_s23 = scalar_select %p2229_p8, 1, 0 }
  0x18   : > { %p2233_p9 = pnand %p1466_p6, %p268_p7  ;;  %s280_s26 = sshll.u32 %s2118_s25, 4  ;;  %s281_s26 = int_to_ptr.vmem [resolvable:$true] %s280_s26 }
  0x19   : > { %s2247_s28 = sand.u32 1, %s2112_s15   ;;  %p2252_p13 = pnand %p1787_p12, %p2220_p4 }
  0x1a   : > { %s2722_s24 = scalar_select %p2233_p9, 1, 0 }
  0x1b   : > { %p1768_p10 = pneg %p2233_p9  ;;  %s2725_s5 = sld [smem:[#allocation27_spill]] }
  0x1c   : > { %s2724_s30 = scalar_select %p2252_p13, 1, 0 }
  0x1d   : > { %p2241_p11 = pnand %p1768_p10, %p2697_p5 }
  0x1f   : > { %s2723_s27 = scalar_select %p2241_p11, 1, 0 }
  0x20   : > { %p2706_p1 = pneg %p2241_p11 }
  0x21   : > { %s1868_s13 = scalar_lea.hbm %s2725_s5, 1024 }
  0x22   : > { %p1869_p0 = scmp.ne.s32.totalorder %s2725_s5, %s1868_s13  ;;  %p1875_p4 = scmp.lt.u32.totalorder %s1868_s13, %s2725_s5 }
  0x24   : > { %p1871_p2 = pnand %p2706_p1, %p1869_p0 }
  0x26   : > { %p1872_p3 = pneg %p1871_p2 }
  0x28   : > { %p1877_p6 = pnand %p1875_p4, %p1872_p3 }
  0x2a   : > { %1880 = shalt.err (!%p1877_p6)
}
  0x2b   : > { %s1881_s29 = scalar_lea.vmem %s281_s26, 1024  ;;  %p1889_p5 = scmp.lt.s32.totalorder %s281_s26, %s281_s26 }
  0x2c   : > { %p1882_p7 = scmp.ne.s32.totalorder %s281_s26, %s1881_s29  ;;  %p1890_p8 = scmp.lt.s32.totalorder %s1881_s29, %s1881_s29 }
  0x2e   : > { %p1884_p10 = pnand %p1882_p7, %p2706_p1  ;;  %p1891_p9 = por %p1890_p8, %p1889_p5 }
  0x30   : > { %p1885_p12 = pneg %p1884_p10 }
  0x32   : > { %p1892_p13 = pnand %p1891_p9, %p1885_p12 }
  0x34   : > { %1895 = shalt.err (!%p1892_p13)
}
  0x35   : > { %s2119_s11 = smov 64   ;;  %s2120_s12 = smov 4  }
  0x36   : > { %1771 = dma.hbm_to_vmem [thread:$0]  (!%p2241_p11), %s2725_s5, 1024, %s281_s26, [#allocation11], %s2119_s11, %s2119_s11, %s2120_s12  }
  0x37   : > { %s2705_s29 = sshll.u32 %s2247_s28, 6  ;;  %s1527_s20 = sshll.u32 %s2116_s16, 10 }
  0x38   : > { %s2726_s1 = sld [smem:[#allocation26_spill]]  ;;  %s334_s15 = scalar_lea.vmem [#allocation7], %s2705_s29 }
  0x39   : > { %s341_s18 = sshll.u32 %s334_s15, 4  ;;  %s2295_s26 = scalar_lea.hbm %s2689_s3, %s1527_s20  ;;  %s2290_s18 = int_to_ptr.vmem [resolvable:$true] %s341_s18 }
  0x3a   : > { %s2727_s13 = sand.u32 1, %s2116_s16   ;;  %p2728_p8 = scmp.ne.s32.totalorder %s2724_s30, 0 }
  0x3b   : > { %s2299_s19 = scalar_lea.sflag [#allocation8], %s2727_s13 }
  0x3c   : > { %p2305_p9 = pneg %p2728_p8 }
  0x3e   : > { %s2286_s21 = scalar_lea.hbm %s2726_s1, %s1527_s20  ;;  %s1901_s8 = scalar_lea.hbm %s2726_s1, 2048 }
  0x3f   : > { %s1896_s25 = scalar_lea.hbm %s2286_s21, 1024  ;;  %p1902_p2 = scmp.lt.u32.totalorder %s2286_s21, %s2726_s1 }
  0x40   : > { %p1897_p5 = scmp.ne.s32.totalorder %s2286_s21, %s1896_s25  ;;  %p1903_p3 = scmp.lt.u32.totalorder %s1901_s8, %s1896_s25 }
  0x41   : > { %s2729_s22 = scalar_select %p2305_p9, 1, 0 }
  0x42   : > { %p1899_p13 = pnand %p2305_p9, %p1897_p5  ;;  %p1904_p4 = por %p1903_p3, %p1902_p2 }
  0x43   : > { %p1905_p6 = scmp.lt.u32.totalorder %s1896_s25, %s2286_s21 }
  0x44   : > { %p1900_p0 = pneg %p1899_p13 }
  0x45   : > { %p1906_p7 = por %p1905_p6, %p1904_p4 }
  0x47   : > { %p1907_p10 = pnand %p1906_p7, %p1900_p0 }
  0x49   : > { %1910 = shalt.err (!%p1907_p10)
}
  0x4a   : > { %s1911_s13 = scalar_lea.vmem %s2290_s18, 1024  ;;  %s2121_s29 = smov [#allocation7]  }
  0x4b   : > { %p1912_p12 = scmp.ne.s32.totalorder %s2290_s18, %s1911_s13  ;;  %s1916_s15 = sshll.u32 %s2121_s29, 4  ;;  %s1917_s15 = int_to_ptr.vmem [resolvable:$false] %s1916_s15 }
  0x4c   : > { %s1918_s10 = scalar_lea.vmem %s1917_s15, 2048  ;;  %p1919_p1 = scmp.lt.s32.totalorder %s2290_s18, %s1917_s15 }
  0x4d   : > { %p1914_p5 = pnand %p1912_p12, %p2305_p9  ;;  %p1920_p11 = scmp.lt.s32.totalorder %s1918_s10, %s1911_s13 }
  0x4f   : > { %p1915_p13 = pneg %p1914_p5  ;;  %p1921_p2 = por %p1920_p11, %p1919_p1 }
  0x51   : > { %p1922_p3 = pnand %p1921_p2, %p1915_p13 }
  0x53   : > { %1925 = shalt.err (!%p1922_p3)
}
  0x54   : > { %1781 = dma.hbm_to_vmem [thread:$0]  (!%p2728_p8), %s2286_s21, 1024, %s2290_s18, %s2299_s19, %s2119_s11, %s2119_s11, %s2120_s12  }
  0x55   : > { %s2730_s25 = sshll.u32 %s2247_s28, 6  ;;  %s2122_s13 = smov [#allocation12]  }
  0x56   : > { %s361_s8 = scalar_lea.vmem [#allocation9], %s2730_s25  ;;  %s296_s29 = sshll.u32 %s2122_s13, 4  ;;  %s297_s29 = int_to_ptr.vmem [resolvable:$true] %s296_s29 }
  0x57   : > { %s368_s20 = sshll.u32 %s361_s8, 4  ;;  %s1926_s1 = scalar_lea.hbm %s2693_s7, 1024  ;;  %s2334_s20 = int_to_ptr.vmem [resolvable:$true] %s368_s20 }
  0x58   : > { %p1927_p11 = scmp.ne.s32.totalorder %s2693_s7, %s1926_s1  ;;  %p2731_p1 = scmp.ne.s32.totalorder %s2723_s27, 0 }
  0x59   : > { %p1933_p7 = scmp.lt.u32.totalorder %s1926_s1, %s2693_s7 }
  0x5a   : > { %p2732_p0 = pneg %p2731_p1 }
  0x5c   : > { %p1929_p4 = pnand %p1927_p11, %p2732_p0 }
  0x5e   : > { %p1930_p6 = pneg %p1929_p4 }
  0x60   : > { %p1935_p10 = pnand %p1933_p7, %p1930_p6 }
  0x62   : > { %1938 = shalt.err (!%p1935_p10)
}
  0x63   : > { %s1939_s25 = scalar_lea.vmem %s297_s29, 1024  ;;  %p2733_p5 = pmov %p2732_p0 }
  0x64   : > { %p1940_p12 = scmp.ne.s32.totalorder %s297_s29, %s1939_s25  ;;  %p1947_p3 = scmp.lt.s32.totalorder %s297_s29, %s297_s29 }
  0x65   : > { %p1948_p8 = scmp.lt.s32.totalorder %s1939_s25, %s1939_s25 }
  0x66   : > { %p1942_p13 = pnand %p1940_p12, %p2733_p5 }
  0x67   : > { %p1949_p9 = por %p1948_p8, %p1947_p3 }
  0x68   : > { %p1943_p2 = pneg %p1942_p13 }
  0x6a   : > { %p1950_p0 = pnand %p1949_p9, %p1943_p2 }
  0x6c   : > { %1953 = shalt.err (!%p1950_p0)
}
  0x6d   : > { %1774 = dma.hbm_to_vmem [thread:$0]  (!%p2731_p1), %s2693_s7, 1024, %s297_s29, [#allocation11], %s2119_s11, %s2119_s11, %s2120_s12  }
  0x6e   : > { %s1470_s6 = sshll.u32 %s2116_s16, 4  ;;  %s316_s27 = scalar_lea.vmem [#allocation4], %s2247_s28 }
  0x6f   : > { %s2363_s15 = scalar_lea.hbm %s2686_s0, %s1470_s6  ;;  %s323_s10 = sshll.u32 %s316_s27, 4  ;;  %s324_s10 = int_to_ptr.vmem [resolvable:$true] %s323_s10 }
  0x70   : > { %s314_s18 = scalar_lea.sflag [#allocation5], %s2247_s28  ;;  %s1954_s21 = scalar_lea.hbm %s2363_s15, 16 }
  0x71   : > { %p1955_p8 = scmp.ne.s32.totalorder %s2363_s15, %s1954_s21  ;;  %p2734_p9 = scmp.ne.s32.totalorder %s2729_s22, 0 }
  0x72   : > { %s1959_s25 = scalar_lea.hbm %s2686_s0, 32  ;;  %p1960_p1 = scmp.lt.u32.totalorder %s2363_s15, %s2686_s0 }
  0x73   : > { %p1957_p11 = pnand %p1955_p8, %p2734_p9  ;;  %p1961_p6 = scmp.lt.u32.totalorder %s1959_s25, %s1954_s21 }
  0x74   : > { %p1963_p10 = scmp.lt.u32.totalorder %s1954_s21, %s2363_s15 }
  0x75   : > { %p1958_p4 = pneg %p1957_p11  ;;  %p1962_p7 = por %p1961_p6, %p1960_p1 }
  0x77   : > { %p1964_p12 = por %p1963_p10, %p1962_p7 }
  0x79   : > { %p1965_p5 = pnand %p1964_p12, %p1958_p4 }
  0x7b   : > { %1968 = shalt.err (!%p1965_p5)
}
  0x7c   : > { %s1969_s28 = scalar_lea.vmem %s324_s10, 16  ;;  %s2123_s6 = smov [#allocation4]  }
  0x7d   : > { %p1970_p13 = scmp.ne.s32.totalorder %s324_s10, %s1969_s28  ;;  %s1974_s8 = sshll.u32 %s2123_s6, 4  ;;  %s1975_s8 = int_to_ptr.vmem [resolvable:$false] %s1974_s8 }
  0x7e   : > { %s1976_s13 = scalar_lea.vmem %s1975_s8, 32  ;;  %p1977_p0 = scmp.lt.s32.totalorder %s324_s10, %s1975_s8 }
  0x7f   : > { %p1972_p2 = pnand %p1970_p13, %p2734_p9  ;;  %p1978_p8 = scmp.lt.s32.totalorder %s1976_s13, %s1969_s28 }
  0x81   : > { %p1973_p3 = pneg %p1972_p2  ;;  %p1979_p11 = por %p1978_p8, %p1977_p0 }
  0x83   : > { %p1980_p1 = pnand %p1979_p11, %p1973_p3 }
  0x85   : > { %1983 = shalt.err (!%p1980_p1)
}
  0x86   : > { %p2735_p6 = scmp.ne.s32.totalorder %s2724_s30, 0  ;;  %s1984_s27 = scalar_lea.hbm %s2295_s26, 1024 }
  0x87   : > { %p1985_p4 = scmp.ne.s32.totalorder %s2295_s26, %s1984_s27  ;;  %s1989_s16 = scalar_lea.hbm %s2689_s3, 2048 }
  0x88   : > { %1778 = dma.hbm_to_vmem [thread:$0]  (!%p2735_p6), %s2363_s15, 16, %s324_s10, %s314_s18  }
  0x89   : > { %p1987_p7 = pnand %p1985_p4, %p2734_p9  ;;  %p1990_p12 = scmp.lt.u32.totalorder %s2295_s26, %s2689_s3 }
  0x8a   : > { %p1991_p5 = scmp.lt.u32.totalorder %s1989_s16, %s1984_s27  ;;  %p1993_p2 = scmp.lt.u32.totalorder %s1984_s27, %s2295_s26 }
  0x8b   : > { %p1988_p10 = pneg %p1987_p7 }
  0x8c   : > { %p1992_p13 = por %p1991_p5, %p1990_p12 }
  0x8e   : > { %p1994_p3 = por %p1993_p2, %p1992_p13 }
  0x90   : > { %p1995_p0 = pnand %p1994_p3, %p1988_p10 }
  0x92   : > { %1998 = shalt.err (!%p1995_p0)
}
  0x93   : > { %s1999_s15 = scalar_lea.vmem %s2334_s20, 1024  ;;  %s2124_s10 = smov [#allocation9]  }
  0x94   : > { %p2000_p8 = scmp.ne.s32.totalorder %s2334_s20, %s1999_s15  ;;  %s2004_s18 = sshll.u32 %s2124_s10, 4  ;;  %s2005_s18 = int_to_ptr.vmem [resolvable:$false] %s2004_s18 }
  0x95   : > { %s2006_s5 = scalar_lea.vmem %s2005_s18, 2048  ;;  %p2007_p4 = scmp.lt.s32.totalorder %s2334_s20, %s2005_s18 }
  0x96   : > { %p2002_p11 = pnand %p2000_p8, %p2734_p9  ;;  %p2008_p7 = scmp.lt.s32.totalorder %s2006_s5, %s1999_s15 }
  0x98   : > { %p2003_p1 = pneg %p2002_p11  ;;  %p2009_p12 = por %p2008_p7, %p2007_p4 }
  0x9a   : > { %p2010_p5 = pnand %p2009_p12, %p2003_p1 }
  0x9c   : > { %2013 = shalt.err (!%p2010_p5)
}
  0x9d   : > { %1784 = dma.hbm_to_vmem [thread:$0]  (!%p2735_p6), %s2295_s26, 1024, %s2334_s20, %s2299_s19, %s2119_s11, %s2119_s11, %s2120_s12  }
  0x9e   : > { %p2736_p9 = scmp.ne.s32.totalorder %s2722_s24, 0 }
  0x9f   : > { %s2412_s22 = sand.u32 (!%p2736_p9), 1, %s2108_s14   ;;  %p2737_p10 = scmp.ne.s32.totalorder (!%p2736_p9), %s2721_s23, 0 }
  0xa0   : > { %386 = sbr.rel (%p2736_p9) target bundleno = 1428 (0x594), region = 56  ;;  %s389_s28 = scalar_lea.sflag (!%p2736_p9), [#allocation5], %s2412_s22 }
  0xa1   : > { %s391_s6 = scalar_lea.vmem (!%p2736_p9), [#allocation4], %s2412_s22 }
  0xa7   : > { %2083 = dma.done.wait (%p2737_p10), %s389_s28, 16  }
  0xa8   : > { %2085 = vsyncadd (%p2737_p10), %s389_s28, 4294967280  ;;  %s396_s30 = sand.u32 1, %s2205_s17   ;;  %s1478_s11 = sshll.u32 %s2412_s22, 6 }
  0xa9   : > { %s397_s24 = scalar_lea.sflag [#allocation8], %s396_s30  ;;  %s2422_s12 = scalar_lea.vmem [#allocation7], %s1478_s11 }
  0xaa   : > { %2087 = dma.done.wait (%p2737_p10), %s397_s24, 2048  }
  0xab   : > { %2089 = vsyncadd (%p2737_p10), %s397_s24, 4294965248  ;;  %s2428_s26 = scalar_lea.vmem [#allocation9], %s1478_s11  ;;  %p2738_p6 = scmp.eq.s32.totalorder %s2205_s17, 0 }
  0xad   : > { %2091 = dma.done.wait (%p2738_p6), [#allocation11], 2048   ;;  %p2739_p13 = pmov %p2738_p6 }
  0xae   : > { %p462_p2 = scmp.lt.s32.totalorder %s2205_s17, 1  ;;  %s2125_s19 = smov [#allocation2]  }
  0xaf   : > { %2093 = vsyncadd (%p2739_p13), [#allocation11], 4294965248  ;;  %s480_s20 = sshll.u32 %s2125_s19, 4  ;;  %s2014_s15 = scalar_lea.hbm %s2695_s9, 2048  ;;  %s481_s20 = int_to_ptr.vmem [resolvable:$true] %s480_s20 }
  0xb0   : > { %s2436_s8 = scalar_select %p462_p2, %s2205_s17, 1 }
  0xb1   : > { %p2015_p3 = scmp.ne.s32.totalorder %s2695_s9, %s2014_s15  ;;  %p2740_p0 = pmov %p2738_p6 }
  0xb2   : > { %s464_s27 = scalar_lea.vmem %s2688_s2, %s2436_s8  ;;  %s467_s16 = scalar_lea.vmem %s2690_s4, %s2436_s8 }
  0xb3   : > { %p2016_p8 = pnand %p2015_p3, %p2740_p0  ;;  %p2020_p1 = scmp.lt.u32.totalorder %s2014_s15, %s2695_s9 }
  0xb5   : > { %p2017_p11 = pneg %p2016_p8 }
  0xb7   : > { %p2022_p4 = pnand %p2020_p1, %p2017_p11 }
  0xb9   : > { %2025 = shalt.err (!%p2022_p4)  }
  0xba   : > { %s2026_s30 = scalar_lea.vmem %s481_s20, 2048  ;;  %p2741_p12 = pmov %p2740_p0 }
  0xbb   : > { %p2027_p7 = scmp.ne.s32.totalorder %s481_s20, %s2026_s30  ;;  %p2033_p10 = scmp.lt.s32.totalorder %s481_s20, %s481_s20 }
  0xbc   : > { %p2034_p6 = scmp.lt.s32.totalorder %s2026_s30, %s2026_s30 }
  0xbd   : > { %p2028_p5 = pnand %p2027_p7, %p2741_p12 }
  0xbe   : > { %p2035_p13 = por %p2034_p6, %p2033_p10 }
  0xbf   : > { %p2029_p9 = pneg %p2028_p5 }
  0xc1   : > { %p2036_p2 = pnand %p2035_p13, %p2029_p9 }
  0xc3   : > { %2039 = shalt.err (!%p2036_p2)  }
  0xc4   : > { %p2742_p3 = pmov %p2740_p0 }
  0xc6   : > { %1762 = dma.hbm_to_vmem [thread:$0]  (%p2742_p3), %s2695_s9, 2048, %s481_s20, [#allocation3] }
  0xc7   : > { %2095 = dma.done.wait (%p2740_p0), [#allocation3], 2048  ;;  %p2743_p8 = pmov %p2740_p0 }
  0xc8   : > { %v2468_v0 = vld [vmem:[#allocation2] sm:$0xff]  ;;  %v2470_v1 = vld [vmem:[#allocation2 + $0x8] sm:$0xff]  ;;  %v2472_v2 = vld [vmem:[#allocation2 + $0x10] sm:$0xff]  ;;  %p1510_p11 = scmp.ge.s32.totalorder %s2205_s17, 1 }
  0xc9   : > { %2097 = vsyncadd (%p2743_p8), [#allocation3], 4294965248  ;;  %v519_v3 = vpack.c.bf16 %v2470_v1, %v2468_v0  ;;  %v2476_v4 = vld [vmem:[#allocation2 + $0x18] sm:$0xff]  ;;  %v2480_v6 = vld [vmem:[#allocation2 + $0x20] sm:$0xff] }
  0xca   : > { %v520_v5 = vpack.c.bf16 %v2476_v4, %v2472_v2  ;;  %v2482_v7 = vld [vmem:[#allocation2 + $0x28] sm:$0xff]  ;;  %v2484_v8 = vld [vmem:[#allocation2 + $0x30] sm:$0xff]  ;;  %v2488_v10 = vld [vmem:[#allocation2 + $0x38] sm:$0xff] }
  0xcb   : > { %1595 = vmatprep.subr.bf16.mxu0 %v519_v3  ;;  %v521_v9 = vpack.c.bf16 %v2482_v7, %v2480_v6  ;;  %v1835_v11 = vld [vmem:[#allocation10] sm:$0xff]   ;;  %v522_v12 = vpack.c.bf16 %v2488_v10, %v2484_v8  ;;  %v2496_v15 = vld [vmem:[#allocation2 + $0x50] sm:$0xff]  ;;  %v2500_v17 = vld [vmem:[#allocation2 + $0x58] sm:$0xff] }
  0xcc   : > { %1596 = vmatpush3.bf16.msra.mxu0 %v519_v3  ;;  %1611 = vmatprep.mubr.bf16.mxu0 %v1835_v11  ;;  %v2492_v13 = vld [vmem:[#allocation2 + $0x40] sm:$0xff]  ;;  %v2494_v14 = vld [vmem:[#allocation2 + $0x48] sm:$0xff]  ;;  %v524_v21 = vpack.c.bf16 %v2500_v17, %v2496_v15  ;;  %v1845_v23 = vld [vmem:[%s2422_s12 + $0x10] sm:$0xff]  }
  0xcd   : > { %1597 = vmatprep.subr.bf16.mxu0 %v520_v5  ;;  %v523_v16 = vpack.c.bf16 %v2494_v14, %v2492_v13  ;;  %v1843_v18 = vld [vmem:[%s2422_s12] sm:$0xff]   ;;  %v1844_v19 = vld [vmem:[%s2422_s12 + $0x8] sm:$0xff]   ;;  %v2513_v25 = vld [vmem:[#allocation2 + $0x78] sm:$0xff] }
  0xce   : > { %v2504_v20 = vld [vmem:[#allocation2 + $0x60] sm:$0xff]  ;;  %1627 = vmatprep.subr.bf16.mxu1 %v1843_v18  ;;  %v2508_v22 = vld [vmem:[#allocation2 + $0x68] sm:$0xff]  ;;  %v2511_v24 = vld [vmem:[#allocation2 + $0x70] sm:$0xff] }
  0xcf   : > { %1628 = vmatpush3.bf16.msra.mxu1 %v1843_v18  ;;  %v1846_v26 = vld [vmem:[%s2422_s12 + $0x18] sm:$0xff]   ;;  %v525_v27 = vpack.c.bf16 %v2508_v22, %v2504_v20  ;;  %v526_v28 = vpack.c.bf16 %v2513_v25, %v2511_v24  ;;  %v1847_v29 = vld [vmem:[%s2422_s12 + $0x20] sm:$0xff]   ;;  %v1848_v30 = vld [vmem:[%s2422_s12 + $0x28] sm:$0xff]  }
  0xd0   : > { %1598 = vmatpush3.bf16.msra.mxu0 %v520_v5  ;;  %1629 = vmatprep.subr.bf16.mxu1 %v1844_v19  ;;  %v1836_v31 = vld [vmem:[#allocation10 + $0x8] sm:$0xff]   ;;  %v1837_v32 = vld [vmem:[#allocation10 + $0x10] sm:$0xff]   ;;  %v1838_v33 = vld [vmem:[#allocation10 + $0x18] sm:$0xff]  }
  0xd1   : > { %1599 = vmatprep.subr.bf16.mxu0 %v521_v9  ;;  %v1839_v34 = vld [vmem:[#allocation10 + $0x20] sm:$0xff]   ;;  %v1840_v35 = vld [vmem:[#allocation10 + $0x28] sm:$0xff]   ;;  %v1841_v36 = vld [vmem:[#allocation10 + $0x30] sm:$0xff]  }
  0xd2   : > { %v1842_v37 = vld [vmem:[#allocation10 + $0x38] sm:$0xff]   ;;  %v1849_v38 = vld [vmem:[%s2422_s12 + $0x30] sm:$0xff]   ;;  %v1851_v40 = vld [vmem:[%s2428_s26] sm:$0xff]  }
  0xd3   : > { %1630 = vmatpush3.bf16.msra.mxu1 %v1844_v19  ;;  %v1850_v39 = vld [vmem:[%s2422_s12 + $0x38] sm:$0xff]   ;;  %v1852_v41 = vld [vmem:[%s2428_s26 + $0x8] sm:$0xff]   ;;  %v1853_v42 = vld [vmem:[%s2428_s26 + $0x10] sm:$0xff]  }
  0xd4   : > { %1600 = vmatpush3.bf16.msra.mxu0 %v521_v9  ;;  %1631 = vmatprep.subr.bf16.mxu1 %v1845_v23  ;;  %v2528_v43 = vld [vmem:[%s2428_s26 + $0x18] sm:$0xff]   ;;  %v2532_v44 = vld [vmem:[%s2428_s26 + $0x20] sm:$0xff]   ;;  %v2537_v45 = vld [vmem:[%s2428_s26 + $0x28] sm:$0xff]  }
  0xd5   : > { %1601 = vmatprep.subr.bf16.mxu0 %v522_v12  ;;  %v1491_v46 = vld [vmem:[%s391_s6] ss:$0 sm:$0xff] }
  0xd6   : > { %v681_v47 = vmul.f32 %v1491_v46, %v2472_v2  ;;  %v682_v48 = vmul.f32 %v1491_v46, %v2476_v4  ;;  %v679_v50 = vmul.f32 %v1491_v46, %v2468_v0  ;;  %v680_v51 = vmul.f32 %v1491_v46, %v2470_v1 }
  0xd7   : > { %1632 = vmatpush3.bf16.msra.mxu1 %v1845_v23  ;;  %v685_v61 = vmul.f32 %v1491_v46, %v2484_v8  ;;  %v686_v62 = vmul.f32 %v1491_v46, %v2488_v10  ;;  %v683_v2 = vmul.f32 %v1491_v46, %v2480_v6  ;;  %v684_v0 = vmul.f32 %v1491_v46, %v2482_v7 }
  0xd8   : > { %1602 = vmatpush3.bf16.msra.mxu0 %v522_v12  ;;  %1633 = vmatprep.subr.bf16.mxu1 %v1846_v26  ;;  %v689_v10 = vmul.f32 %v1491_v46, %v2496_v15  ;;  %v690_v18 = vmul.f32 %v1491_v46, %v2500_v17  ;;  %v687_v7 = vmul.f32 %v1491_v46, %v2492_v13 }
  0xd9   : > { %1603 = vmatprep.subr.bf16.mxu0 %v523_v16  ;;  %v688_v19 = vmul.f32 %v1491_v46, %v2494_v14  ;;  %v694_v13 = vmul.f32 %v1491_v46, %v2513_v25 }
  0xdb   : > { %1634 = vmatpush3.bf16.msra.mxu1 %v1846_v26 }
  0xdc   : > { %1604 = vmatpush3.bf16.msra.mxu0 %v523_v16  ;;  %1635 = vmatprep.subr.bf16.mxu1 %v1847_v29 }
  0xdd   : > { %1605 = vmatprep.subr.bf16.mxu0 %v524_v21 }
  0xdf   : > { %1636 = vmatpush3.bf16.msra.mxu1 %v1847_v29 }
  0xe0   : > { %1606 = vmatpush3.bf16.msra.mxu0 %v524_v21  ;;  %1637 = vmatprep.subr.bf16.mxu1 %v1848_v30 }
  0xe1   : > { %1607 = vmatprep.subr.bf16.mxu0 %v525_v27 }
  0xe3   : > { %1638 = vmatpush3.bf16.msra.mxu1 %v1848_v30 }
  0xe4   : > { %1608 = vmatpush3.bf16.msra.mxu0 %v525_v27  ;;  %1639 = vmatprep.subr.bf16.mxu1 %v1849_v38 }
  0xe5   : > { %1609 = vmatprep.subr.bf16.mxu0 %v526_v28 }
  0xe7   : > { %1640 = vmatpush3.bf16.msra.mxu1 %v1849_v38 }
  0xe8   : > { %1610 = vmatpush3.bf16.msra.mxu0 %v526_v28  ;;  %1641 = vmatprep.subr.bf16.mxu1 %v1850_v39 }
  0xe9   : > { %1659 = vmatprep.subr.bf16.mxu0 %v1851_v40 }
  0xeb   : > { %1612 = vmatmul.mubr.bf16.vlgmr.msra.gmra.mrb[0].mxu0 %v1836_v31  ;;  %1642 = vmatpush3.bf16.msra.mxu1 %v1850_v39  ;;  %v693_v31 = vmul.f32 %v1491_v46, %v2511_v24 }
  0xec   : > { %1615 = vmatprep.mubr.bf16.mxu0 %v1837_v32  ;;  %1731 = vmatprep.subr.bf16.mxu1 %v1851_v40  ;;  %v691_v32 = vmul.f32 %v1491_v46, %v2504_v20  ;;  %v1857_v20 = vld [vmem:[%s2428_s26 + $0x30] sm:$0xff]  }
  0xed   : > { %1660 = vmatpush3.bf16.msra.mxu0 %v1851_v40 }
  0xee   : > { %1661 = vmatprep.subr.bf16.mxu0 %v1852_v41 }
  0xf1   : > { %1662 = vmatpush3.bf16.msra.mxu0 %v1852_v41 }
  0xf2   : > { %1663 = vmatprep.subr.bf16.mxu0 %v1853_v42 }
  0xf3   : > { %1616 = vmatmul.mubr.bf16.gmra.mrb[4].mxu0 %v1838_v33  ;;  %v692_v33 = vmul.f32 %v1491_v46, %v2508_v22  ;;  %v1858_v22 = vld [vmem:[%s2428_s26 + $0x38] sm:$0xff]  }
  0xf4   : > { %1619 = vmatprep.mubr.bf16.mxu0 %v1839_v34 }
  0xf5   : > { %1664 = vmatpush3.bf16.msra.mxu0 %v1853_v42 }
  0xf6   : > { %1665 = vmatprep.subr.bf16.mxu0 %v2528_v43 }
  0xf9   : > { %1666 = vmatpush3.bf16.msra.mxu0 %v2528_v43 }
  0xfa   : > { %1667 = vmatprep.subr.bf16.mxu0 %v2532_v44 }
  0xfb   : > { %1620 = vmatmul.mubr.bf16.gmra.mrb[8].mxu0 %v1840_v35 }
  0xfc   : > { %1623 = vmatprep.mubr.bf16.mxu0 %v1841_v36 }
  0xfd   : > { %1668 = vmatpush3.bf16.msra.mxu0 %v2532_v44 }
  0xfe   : > { %1669 = vmatprep.subr.bf16.mxu0 %v2537_v45 }
 0x101   : > { %1670 = vmatpush3.bf16.msra.mxu0 %v2537_v45 }
 0x102   : > { %1671 = vmatprep.subr.bf16.mxu0 %v1857_v20 }
 0x103   : > { %1624 = vmatmul.mubr.bf16.gmra.mrb[12].mxu0 %v1842_v37 }
 0x105   : > { %1672 = vmatpush3.bf16.msra.mxu0 %v1857_v20 }
 0x106   : > { %1673 = vmatprep.subr.bf16.mxu0 %v1858_v22 }
 0x109   : > { %1674 = vmatpush3.bf16.msra.mxu0 %v1858_v22 }
 0x1be   : > { %v1613_v49 = vpop.f32.mrb[0].mxu0 }
 0x1bf   : > { %v609_v52 = vpop.f32.mrb[1].mxu0  ;;  %v697_v54 = vadd.f32 %v1613_v49, %v681_v47 }
 0x1c0   : > { %v1614_v53 = vpop.f32.mrb[2].mxu0  ;;  %v695_v57 = vadd.f32 %v679_v50, %v609_v52 }
 0x1c1   : > { %v698_v55 = vadd.f32 %v1614_v53, %v682_v48  ;;  %v612_v56 = vpop.f32.mrb[3].mxu0 }
 0x1c2   : > { %v696_v58 = vadd.f32 %v680_v51, %v612_v56 }
 0x1c3   : > { %v712_v59 = vpack.c.bf16 %v698_v55, %v697_v54 }
 0x1c4   : > { %v711_v60 = vpack.c.bf16 %v696_v58, %v695_v57 }
 0x1c6   : > { %v1617_v63 = vpop.f32.mrb[4].mxu0  ;;  %1643 = vmatprep.mubr.bf16.mxu1 %v711_v60 }
 0x1c7   : > { %v625_v1 = vpop.f32.mrb[5].mxu0  ;;  %1644 = vmatmul.mubr.bf16.vlgmr.msra.gmra.mrb[0].mxu1 %v712_v59  ;;  %v701_v4 = vadd.f32 %v1617_v63, %v685_v61 }
 0x1c8   : > { %v1618_v3 = vpop.f32.mrb[6].mxu0  ;;  %1739 = vmatpush3.bf16.msra.mxu1 %v1851_v40  ;;  %v699_v11 = vadd.f32 %v683_v2, %v625_v1 }
 0x1c9   : > { %v702_v5 = vadd.f32 %v1618_v3, %v686_v62  ;;  %v628_v9 = vpop.f32.mrb[7].mxu0  ;;  %1732 = vmatprep.subr.bf16.mxu1 %v1852_v41 }
 0x1ca   : > { %v700_v12 = vadd.f32 %v684_v0, %v628_v9 }
 0x1cb   : > { %v714_v16 = vpack.c.bf16 %v702_v5, %v701_v4 }
 0x1cc   : > { %v713_v8 = vpack.c.bf16 %v700_v12, %v699_v11  ;;  %1740 = vmatpush3.bf16.msra.mxu1 %v1852_v41  ;;  %v1492_v41 = vld [vmem:[%s464_s27] ss:$0 sm:$0xff] }
 0x1cd   : > { %1733 = vmatprep.subr.bf16.mxu1 %v1853_v42 }
 0x1ce   : > { %v1621_v6 = vpop.f32.mrb[8].mxu0  ;;  %1647 = vmatprep.mubr.bf16.mxu1 %v713_v8 }
 0x1cf   : > { %v641_v21 = vpop.f32.mrb[9].mxu0  ;;  %1648 = vmatmul.mubr.bf16.gmra.mrb[4].mxu1 %v714_v16  ;;  %v705_v26 = vadd.f32 %v1621_v6, %v689_v10 }
 0x1d0   : > { %v1622_v23 = vpop.f32.mrb[10].mxu0  ;;  %1741 = vmatpush3.bf16.msra.mxu1 %v1853_v42  ;;  %v703_v29 = vadd.f32 %v687_v7, %v641_v21 }
 0x1d1   : > { %v706_v27 = vadd.f32 %v1622_v23, %v690_v18  ;;  %v644_v28 = vpop.f32.mrb[11].mxu0  ;;  %1734 = vmatprep.subr.bf16.mxu1 %v2528_v43 }
 0x1d2   : > { %v704_v15 = vadd.f32 %v688_v19, %v644_v28 }
 0x1d3   : > { %v716_v30 = vpack.c.bf16 %v706_v27, %v705_v26 }
 0x1d4   : > { %v715_v17 = vpack.c.bf16 %v704_v15, %v703_v29  ;;  %1742 = vmatpush3.bf16.msra.mxu1 %v2528_v43 }
 0x1d5   : > { %1735 = vmatprep.subr.bf16.mxu1 %v2532_v44 }
 0x1d6   : > { %v1625_v14 = vpop.f32.mrb[12].mxu0  ;;  %1651 = vmatprep.mubr.bf16.mxu1 %v715_v17 }
 0x1d7   : > { %v657_v34 = vpop.f32.mrb[13].mxu0  ;;  %1652 = vmatmul.mubr.bf16.gmra.mrb[8].mxu1 %v716_v30  ;;  %v709_v36 = vadd.f32 %v1625_v14, %v693_v31 }
 0x1d8   : > { %v1626_v35 = vpop.f32.mrb[14].mxu0  ;;  %1743 = vmatpush3.bf16.msra.mxu1 %v2532_v44  ;;  %v707_v25 = vadd.f32 %v691_v32, %v657_v34 }
 0x1d9   : > { %v710_v37 = vadd.f32 %v1626_v35, %v694_v13  ;;  %v660_v24 = vpop.f32.mrb[15].mxu0  ;;  %1736 = vmatprep.subr.bf16.mxu1 %v2537_v45 }
 0x1da   : > { %v708_v38 = vadd.f32 %v692_v33, %v660_v24  ;;  %v1501_v24 = vld [vmem:[%s467_s16] ss:$0 sm:$0xff] }
 0x1db   : > { %v718_v39 = vpack.c.bf16 %v710_v37, %v709_v36 }
 0x1dc   : > { %v717_v40 = vpack.c.bf16 %v708_v38, %v707_v25  ;;  %1744 = vmatpush3.bf16.msra.mxu1 %v2537_v45 }
 0x1dd   : > { %1737 = vmatprep.subr.bf16.mxu1 %v1857_v20 }
 0x1de   : > { %1655 = vmatprep.mubr.bf16.mxu1 %v717_v40 }
 0x1df   : > { %1656 = vmatmul.mubr.bf16.gmra.mrb[12].mxu1 %v718_v39 }
 0x1e0   : > { %1745 = vmatpush3.bf16.msra.mxu1 %v1857_v20 }
 0x1e1   : > { %1738 = vmatprep.subr.bf16.mxu1 %v1858_v22 }
 0x1e4   : > { %1746 = vmatpush3.bf16.msra.mxu1 %v1858_v22 }
 0x29a   : > { %v1645_v42 = vpop.f32.mrb[0].mxu1 }
 0x29b   : > { %v833_v43 = vadd.f32 %v1645_v42, %v1492_v41  ;;  %v824_v44 = vpop.f32.mrb[1].mxu1 }
 0x29c   : > { %v825_v45 = vadd.f32 %v1492_v41, %v824_v44  ;;  %v1646_v46 = vpop.f32.mrb[2].mxu1 }
 0x29d   : > { %v836_v47 = vadd.f32 %v1646_v46, %v1492_v41  ;;  %v827_v48 = vpop.f32.mrb[3].mxu1  ;;  %v889_v50 = vmax.f32 %v833_v43, 0.0 }
 0x29e   : > { %v828_v49 = vadd.f32 %v1492_v41, %v827_v48  ;;  %v887_v52 = vmax.f32 %v825_v45, 0.0 }
 0x29f   : > { %v890_v51 = vmax.f32 %v836_v47, 0.0 }
 0x2a0   : > { %v888_v53 = vmax.f32 %v828_v49, 0.0 }
 0x2a1   : > { %v904_v54 = vpack.c.bf16 %v890_v51, %v889_v50 }
 0x2a2   : > { %v903_v55 = vpack.c.bf16 %v888_v53, %v887_v52  ;;  %v1649_v56 = vpop.f32.mrb[4].mxu1 }
 0x2a3   : > { %v849_v57 = vadd.f32 %v1649_v56, %v1492_v41  ;;  %v840_v58 = vpop.f32.mrb[5].mxu1 }
 0x2a4   : > { %v841_v59 = vadd.f32 %v1492_v41, %v840_v58  ;;  %v1650_v60 = vpop.f32.mrb[6].mxu1  ;;  %1675 = vmatprep.mubr.bf16.mxu0 %v903_v55 }
 0x2a5   : > { %v852_v61 = vadd.f32 %v1650_v60, %v1492_v41  ;;  %v843_v62 = vpop.f32.mrb[7].mxu1  ;;  %1676 = vmatmul.mubr.bf16.vlgmr.msra.gmra.mrb[16].mxu0 %v904_v54  ;;  %v893_v2 = vmax.f32 %v849_v57, 0.0 }
 0x2a6   : > { %v844_v63 = vadd.f32 %v1492_v41, %v843_v62  ;;  %v891_v1 = vmax.f32 %v841_v59, 0.0 }
 0x2a7   : > { %v894_v0 = vmax.f32 %v852_v61, 0.0 }
 0x2a8   : > { %v892_v3 = vmax.f32 %v844_v63, 0.0 }
 0x2a9   : > { %v906_v4 = vpack.c.bf16 %v894_v0, %v893_v2 }
 0x2aa   : > { %v905_v5 = vpack.c.bf16 %v892_v3, %v891_v1  ;;  %v1653_v9 = vpop.f32.mrb[8].mxu1 }
 0x2ab   : > { %v865_v11 = vadd.f32 %v1653_v9, %v1492_v41  ;;  %v856_v12 = vpop.f32.mrb[9].mxu1 }
 0x2ac   : > { %v857_v16 = vadd.f32 %v1492_v41, %v856_v12  ;;  %v1654_v8 = vpop.f32.mrb[10].mxu1  ;;  %1679 = vmatprep.mubr.bf16.mxu0 %v905_v5 }
 0x2ad   : > { %v868_v10 = vadd.f32 %v1654_v8, %v1492_v41  ;;  %v859_v18 = vpop.f32.mrb[11].mxu1  ;;  %1680 = vmatmul.mubr.bf16.gmra.mrb[20].mxu0 %v906_v4  ;;  %v897_v7 = vmax.f32 %v865_v11, 0.0 }
 0x2ae   : > { %v860_v6 = vadd.f32 %v1492_v41, %v859_v18  ;;  %v895_v21 = vmax.f32 %v857_v16, 0.0 }
 0x2af   : > { %v898_v19 = vmax.f32 %v868_v10, 0.0 }
 0x2b0   : > { %v896_v23 = vmax.f32 %v860_v6, 0.0 }
 0x2b1   : > { %v908_v26 = vpack.c.bf16 %v898_v19, %v897_v7 }
 0x2b2   : > { %v907_v27 = vpack.c.bf16 %v896_v23, %v895_v21  ;;  %v1657_v28 = vpop.f32.mrb[12].mxu1 }
 0x2b3   : > { %v881_v29 = vadd.f32 %v1657_v28, %v1492_v41  ;;  %v872_v15 = vpop.f32.mrb[13].mxu1 }
 0x2b4   : > { %v873_v30 = vadd.f32 %v1492_v41, %v872_v15  ;;  %v1658_v17 = vpop.f32.mrb[14].mxu1  ;;  %1683 = vmatprep.mubr.bf16.mxu1 %v907_v27 }
 0x2b5   : > { %v884_v31 = vadd.f32 %v1658_v17, %v1492_v41  ;;  %v875_v13 = vpop.f32.mrb[15].mxu1  ;;  %1684 = vmatmul.mubr.bf16.vlgmr.msra.gmra.mrb[16].mxu1 %v908_v26  ;;  %v901_v32 = vmax.f32 %v881_v29, 0.0 }
 0x2b6   : > { %v876_v14 = vadd.f32 %v1492_v41, %v875_v13  ;;  %v899_v34 = vmax.f32 %v873_v30, 0.0 }
 0x2b7   : > { %v902_v33 = vmax.f32 %v884_v31, 0.0 }
 0x2b8   : > { %v900_v35 = vmax.f32 %v876_v14, 0.0 }
 0x2b9   : > { %v910_v36 = vpack.c.bf16 %v902_v33, %v901_v32 }
 0x2ba   : > { %v909_v37 = vpack.c.bf16 %v900_v35, %v899_v34 }
 0x2bc   : > { %1687 = vmatprep.mubr.bf16.mxu1 %v909_v37 }
 0x2bd   : > { %1688 = vmatmul.mubr.bf16.gmra.mrb[20].mxu1 %v910_v36 }
 0x378   : > { %v1677_v25 = vpop.f32.mrb[16].mxu0 }
 0x379   : > { %v2578_v38 = vadd.f32 %v1677_v25, %v1501_v24  ;;  %v1016_v39 = vpop.f32.mrb[17].mxu0 }
 0x37a   : > { %v2580_v40 = vadd.f32 %v1501_v24, %v1016_v39  ;;  %v1678_v20 = vpop.f32.mrb[18].mxu0 }
 0x37b   : > { %1081 = vst [vmem:[#allocation2 + $0x10] sm:$0xff] %v2578_v38  ;;  %v2583_v22 = vadd.f32 %v1678_v20, %v1501_v24  ;;  %v1019_v41 = vpop.f32.mrb[19].mxu0 }
 0x37c   : > { %1079 = vst [vmem:[#allocation2] sm:$0xff] %v2580_v40  ;;  %v2586_v42 = vadd.f32 %v1501_v24, %v1019_v41 }
 0x37d   : > { %1082 = vst [vmem:[#allocation2 + $0x18] sm:$0xff] %v2583_v22 }
 0x37e   : > { %1080 = vst [vmem:[#allocation2 + $0x8] sm:$0xff] %v2586_v42 }
 0x380   : > { %v1681_v43 = vpop.f32.mrb[20].mxu0 }
 0x381   : > { %v2590_v44 = vadd.f32 %v1681_v43, %v1501_v24  ;;  %v1032_v45 = vpop.f32.mrb[21].mxu0 }
 0x382   : > { %v2592_v46 = vadd.f32 %v1501_v24, %v1032_v45  ;;  %v1682_v47 = vpop.f32.mrb[22].mxu0  ;;  %v1101_v5 = vld [vmem:[#allocation2 + $0x10] sm:$0xff] (!%p1510_p11) }
 0x383   : > { %1085 = vst [vmem:[#allocation2 + $0x30] sm:$0xff] %v2590_v44  ;;  %v2595_v48 = vadd.f32 %v1682_v47, %v1501_v24  ;;  %v1035_v49 = vpop.f32.mrb[23].mxu0  ;;  %v1099_v3 = vld [vmem:[#allocation2] sm:$0xff] (!%p1510_p11)  ;;  %v1117_v12 = vmax.f32 (!%p1510_p11), %v1101_v5, 0.0 }
 0x384   : > { %1083 = vst [vmem:[#allocation2 + $0x20] sm:$0xff] %v2592_v46  ;;  %v2598_v50 = vadd.f32 %v1501_v24, %v1035_v49  ;;  %v1115_v9 = vmax.f32 (!%p1510_p11), %v1099_v3, 0.0  ;;  %v1102_v16 = vld [vmem:[#allocation2 + $0x18] sm:$0xff] (!%p1510_p11) }
 0x385   : > { %1086 = vst [vmem:[#allocation2 + $0x38] sm:$0xff] %v2595_v48  ;;  %v1100_v4 = vld [vmem:[#allocation2 + $0x8] sm:$0xff] (!%p1510_p11)  ;;  %v1118_v18 = vmax.f32 (!%p1510_p11), %v1102_v16, 0.0  ;;  %1133 = vst [vmem:[#allocation2 + $0x10] sm:$0xff] (!%p1510_p11), %v1117_v12 }
 0x386   : > { %1084 = vst [vmem:[#allocation2 + $0x28] sm:$0xff] %v2598_v50  ;;  %v1116_v11 = vmax.f32 (!%p1510_p11), %v1100_v4, 0.0  ;;  %1131 = vst [vmem:[#allocation2] sm:$0xff] (!%p1510_p11), %v1115_v9 }
 0x387   : > { %1134 = vst [vmem:[#allocation2 + $0x18] sm:$0xff] (!%p1510_p11), %v1118_v18 }
 0x388   : > { %v1685_v51 = vpop.f32.mrb[16].mxu1  ;;  %1132 = vst [vmem:[#allocation2 + $0x8] sm:$0xff] (!%p1510_p11), %v1116_v11 }
 0x389   : > { %v2602_v52 = vadd.f32 %v1685_v51, %v1501_v24  ;;  %v1048_v53 = vpop.f32.mrb[17].mxu1 }
 0x38a   : > { %v2604_v54 = vadd.f32 %v1501_v24, %v1048_v53  ;;  %v1686_v55 = vpop.f32.mrb[18].mxu1  ;;  %v1105_v19 = vld [vmem:[#allocation2 + $0x30] sm:$0xff] (!%p1510_p11) }
 0x38b   : > { %1089 = vst [vmem:[#allocation2 + $0x50] sm:$0xff] %v2602_v52  ;;  %v2607_v56 = vadd.f32 %v1686_v55, %v1501_v24  ;;  %v1051_v57 = vpop.f32.mrb[19].mxu1  ;;  %v1103_v8 = vld [vmem:[#allocation2 + $0x20] sm:$0xff] (!%p1510_p11)  ;;  %v1121_v26 = vmax.f32 (!%p1510_p11), %v1105_v19, 0.0 }
 0x38c   : > { %1087 = vst [vmem:[#allocation2 + $0x40] sm:$0xff] %v2604_v54  ;;  %v2610_v58 = vadd.f32 %v1501_v24, %v1051_v57  ;;  %v1119_v6 = vmax.f32 (!%p1510_p11), %v1103_v8, 0.0  ;;  %v1106_v21 = vld [vmem:[#allocation2 + $0x38] sm:$0xff] (!%p1510_p11) }
 0x38d   : > { %1090 = vst [vmem:[#allocation2 + $0x58] sm:$0xff] %v2607_v56  ;;  %v1104_v10 = vld [vmem:[#allocation2 + $0x28] sm:$0xff] (!%p1510_p11)  ;;  %v1122_v27 = vmax.f32 (!%p1510_p11), %v1106_v21, 0.0  ;;  %1137 = vst [vmem:[#allocation2 + $0x30] sm:$0xff] (!%p1510_p11), %v1121_v26 }
 0x38e   : > { %1088 = vst [vmem:[#allocation2 + $0x48] sm:$0xff] %v2610_v58  ;;  %v1120_v7 = vmax.f32 (!%p1510_p11), %v1104_v10, 0.0  ;;  %1135 = vst [vmem:[#allocation2 + $0x20] sm:$0xff] (!%p1510_p11), %v1119_v6 }
 0x38f   : > { %1138 = vst [vmem:[#allocation2 + $0x38] sm:$0xff] (!%p1510_p11), %v1122_v27 }
 0x390   : > { %v1689_v59 = vpop.f32.mrb[20].mxu1  ;;  %1098 = sbr.rel (%p1510_p11) target bundleno = 929 (0x3a1), region = 88  ;;  %1136 = vst [vmem:[#allocation2 + $0x28] sm:$0xff] (!%p1510_p11), %v1120_v7 }
 0x391   : > { %v2614_v60 = vadd.f32 %v1689_v59, %v1501_v24  ;;  %v1064_v61 = vpop.f32.mrb[21].mxu1 }
 0x392   : > { %v2616_v62 = vadd.f32 %v1501_v24, %v1064_v61  ;;  %v1690_v63 = vpop.f32.mrb[22].mxu1  ;;  %v1109_v15 = vld [vmem:[#allocation2 + $0x50] sm:$0xff] (!%p1510_p11) }
 0x393   : > { %1093 = vst [vmem:[#allocation2 + $0x70] sm:$0xff] %v2614_v60  ;;  %v2619_v2 = vadd.f32 %v1690_v63, %v1501_v24  ;;  %v1067_v0 = vpop.f32.mrb[23].mxu1  ;;  %v1107_v23 = vld [vmem:[#allocation2 + $0x40] sm:$0xff] (!%p1510_p11)  ;;  %v1125_v31 = vmax.f32 (!%p1510_p11), %v1109_v15, 0.0 }
 0x394   : > { %1091 = vst [vmem:[#allocation2 + $0x60] sm:$0xff] %v2616_v62  ;;  %v2622_v1 = vadd.f32 %v1501_v24, %v1067_v0  ;;  %v1123_v28 = vmax.f32 (!%p1510_p11), %v1107_v23, 0.0  ;;  %v1110_v30 = vld [vmem:[#allocation2 + $0x58] sm:$0xff] (!%p1510_p11) }
 0x395   : > { %1094 = vst [vmem:[#allocation2 + $0x78] sm:$0xff] %v2619_v2  ;;  %v1108_v29 = vld [vmem:[#allocation2 + $0x48] sm:$0xff] (!%p1510_p11)  ;;  %v1126_v13 = vmax.f32 (!%p1510_p11), %v1110_v30, 0.0  ;;  %1141 = vst [vmem:[#allocation2 + $0x50] sm:$0xff] (!%p1510_p11), %v1125_v31 }
 0x396   : > { %1092 = vst [vmem:[#allocation2 + $0x68] sm:$0xff] %v2622_v1  ;;  %v1124_v17 = vmax.f32 (!%p1510_p11), %v1108_v29, 0.0  ;;  %1139 = vst [vmem:[#allocation2 + $0x40] sm:$0xff] (!%p1510_p11), %v1123_v28 }
 0x397   : > { %1142 = vst [vmem:[#allocation2 + $0x58] sm:$0xff] %v1126_v13 }
 0x398   : > { %1140 = vst [vmem:[#allocation2 + $0x48] sm:$0xff] %v1124_v17 }
 0x39a   : > { %v1113_v33 = vld [vmem:[#allocation2 + $0x70] sm:$0xff] }
 0x39b   : > { %v1111_v14 = vld [vmem:[#allocation2 + $0x60] sm:$0xff]  ;;  %v1129_v36 = vmax.f32 %v1113_v33, 0.0 }
 0x39c   : > { %v1127_v34 = vmax.f32 %v1111_v14, 0.0  ;;  %v1114_v37 = vld [vmem:[#allocation2 + $0x78] sm:$0xff] }
 0x39d   : > { %v1112_v32 = vld [vmem:[#allocation2 + $0x68] sm:$0xff]  ;;  %v1130_v24 = vmax.f32 %v1114_v37, 0.0  ;;  %1145 = vst [vmem:[#allocation2 + $0x70] sm:$0xff] %v1129_v36 }
 0x39e   : > { %v1128_v35 = vmax.f32 %v1112_v32, 0.0  ;;  %1143 = vst [vmem:[#allocation2 + $0x60] sm:$0xff] %v1127_v34 }
 0x39f   : > { %1146 = vst [vmem:[#allocation2 + $0x78] sm:$0xff] %v1130_v24 }
 0x3a0   : > { %1144 = vst [vmem:[#allocation2 + $0x68] sm:$0xff] %v1128_v35 }
 0x3a1 PF: > { %p1511_p1 = scmp.ne.s32.totalorder %s2205_s17, 1 }
 0x3a2   : > { %v1153_v25 = vpack.c.bf16 (!%p1511_p1), %v2586_v42, %v2580_v40  ;;  %v2126_v39 = vmov (!%p1511_p1), 0.0   ;;  %v1860_v20 = vld [vmem:[#allocation12] sm:$0xff] (!%p1511_p1)   ;;  %v1154_v41 = vpack.c.bf16 (!%p1511_p1), %v2583_v22, %v2578_v38  ;;  %vm2127_vm0 = vmmov (!%p1511_p1), 0   ;;  %v1861_v43 = vld [vmem:[#allocation12 + $0x8] sm:$0xff] (!%p1511_p1)   ;;  %v1862_v40 = vld [vmem:[#allocation12 + $0x10] sm:$0xff] (!%p1511_p1)   ;;  %s2744_s8 = sld [smem:[#allocation28_spill]] (!%p1511_p1) }
 0x3a3   : > { %1150 = sbr.rel (%p1511_p1) target bundleno = 1396 (0x574), region = 92  ;;  %1691 = vmatprep.subr.bf16.mxu0 (!%p1511_p1), %v2126_v39  ;;  %1711 = vmatprep.subr.bf16.mxu1 (!%p1511_p1), %v2126_v39  ;;  %v1155_v45 = vpack.c.bf16 (!%p1511_p1), %v2598_v50, %v2592_v46  ;;  %v1156_v38 = vpack.c.bf16 (!%p1511_p1), %v2595_v48, %v2590_v44  ;;  %v1863_v22 = vld [vmem:[#allocation12 + $0x18] sm:$0xff] (!%p1511_p1)   ;;  %v1157_v42 = vpack.c.bf16 (!%p1511_p1), %v2610_v58, %v2604_v54  ;;  %v1864_v47 = vld [vmem:[#allocation12 + $0x20] sm:$0xff] (!%p1511_p1)   ;;  %v1865_v49 = vld [vmem:[#allocation12 + $0x28] sm:$0xff] (!%p1511_p1)   ;;  %s2745_s27 = sld [smem:[#allocation29_spill]] (!%p1511_p1) }
 0x3a4   : > { %1692 = vmatpush3.bf16.msra.mxu0 (!%p1511_p1), %v1153_v25  ;;  %1707 = vmatprep.mubr.msk.bf16.mxu0 (!%p1511_p1), %vm2127_vm0, %v2126_v39  ;;  %v1158_v46 = vpack.c.bf16 (!%p1511_p1), %v2607_v56, %v2602_v52  ;;  %v1159_v44 = vpack.c.bf16 (!%p1511_p1), %v2622_v1, %v2616_v62  ;;  %v1866_v48 = vld [vmem:[#allocation12 + $0x30] sm:$0xff] (!%p1511_p1)   ;;  %v1160_v50 = vpack.c.bf16 (!%p1511_p1), %v2619_v2, %v2614_v60  ;;  %v1867_v52 = vld [vmem:[#allocation12 + $0x38] sm:$0xff] (!%p1511_p1)  }
 0x3a5   : > { %1693 = vmatprep.subr.bf16.mxu0 (!%p1511_p1), %v2126_v39  ;;  %1712 = vmatpush3.bf16.msra.mxu1 (!%p1511_p1), %v1860_v20 }
 0x3a6   : > { %1727 = vmatprep.mubr.msk.bf16.mxu1 (!%p1511_p1), %vm2127_vm0, %v2126_v39  ;;  %1713 = vmatprep.subr.bf16.mxu1 (!%p1511_p1), %v2126_v39 }
 0x3a8   : > { %1694 = vmatpush3.bf16.msra.mxu0 (!%p1511_p1), %v1154_v41  ;;  %v1859_v51 = vld [vmem:[%s2744_s8] sm:$0xff] (!%p1511_p1)  }
 0x3a9   : > { %1695 = vmatprep.subr.bf16.mxu0 (!%p1511_p1), %v2126_v39  ;;  %1714 = vmatpush3.bf16.msra.mxu1 (!%p1511_p1), %v1861_v43  ;;  %v1513_v58 = vld [vmem:[%s2745_s27] ss:$0 sm:$0xff] (!%p1511_p1) }
 0x3aa   : > { %1715 = vmatprep.subr.bf16.mxu1 %v2126_v39 }
 0x3ac   : > { %1696 = vmatpush3.bf16.msra.mxu0 %v1155_v45 }
 0x3ad   : > { %1697 = vmatprep.subr.bf16.mxu0 %v2126_v39  ;;  %1716 = vmatpush3.bf16.msra.mxu1 %v1862_v40 }
 0x3ae   : > { %1717 = vmatprep.subr.bf16.mxu1 %v2126_v39 }
 0x3b0   : > { %1698 = vmatpush3.bf16.msra.mxu0 %v1156_v38 }
 0x3b1   : > { %1699 = vmatprep.subr.bf16.mxu0 %v2126_v39  ;;  %1718 = vmatpush3.bf16.msra.mxu1 %v1863_v22 }
 0x3b2   : > { %1719 = vmatprep.subr.bf16.mxu1 %v2126_v39 }
 0x3b4   : > { %1700 = vmatpush3.bf16.msra.mxu0 %v1157_v42 }
 0x3b5   : > { %1701 = vmatprep.subr.bf16.mxu0 %v2126_v39  ;;  %1720 = vmatpush3.bf16.msra.mxu1 %v1864_v47 }
 0x3b6   : > { %1721 = vmatprep.subr.bf16.mxu1 %v2126_v39 }
 0x3b8   : > { %1702 = vmatpush3.bf16.msra.mxu0 %v1158_v46 }
 0x3b9   : > { %1703 = vmatprep.subr.bf16.mxu0 %v2126_v39  ;;  %1722 = vmatpush3.bf16.msra.mxu1 %v1865_v49 }
 0x3ba   : > { %1723 = vmatprep.subr.bf16.mxu1 %v2126_v39 }
 0x3bc   : > { %1704 = vmatpush3.bf16.msra.mxu0 %v1159_v44 }
 0x3bd   : > { %1705 = vmatprep.subr.bf16.mxu0 %v2126_v39  ;;  %1724 = vmatpush3.bf16.msra.mxu1 %v1866_v48 }
 0x3be   : > { %1725 = vmatprep.subr.bf16.mxu1 %v2126_v39 }
 0x3c0   : > { %1706 = vmatpush3.bf16.msra.mxu0 %v1160_v50 }
 0x3c1   : > { %1726 = vmatpush3.bf16.msra.mxu1 %v1867_v52 }
 0x3c3   : > { %1708 = vmatmul.mubr.bf16.vlgmr.msra.gmra.mrb[0].mxu0 %v1859_v51 }
 0x496   : > { %v1201_v53 = vpop.f32.mrb[0].mxu0 }
 0x497   : > { %v1709_v54 = vpop.f32.mrb[1].mxu0 }
 0x498   : > { %v1204_v55 = vpop.f32.mrb[2].mxu0 }
 0x499   : > { %v1208_v56 = vpack.c.bf16 %v1204_v55, %v1201_v53  ;;  %v1710_v57 = vpop.f32.mrb[3].mxu0 }
 0x49b   : > { %1728 = vmatmul.mubr.bf16.vlgmr.msra.gmra.mrb[0].mxu1 %v1208_v56 }
 0x56e   : > { %v1314_v59 = vpop.f32.mrb[0].mxu1 }
 0x56f   : > { %v1315_v60 = vadd.f32 %v1513_v58, %v1314_v59  ;;  %v1729_v61 = vpop.f32.mrb[1].mxu1 }
 0x570   : > { %v1317_v62 = vpop.f32.mrb[2].mxu1 }
 0x571   : > { %1321 = vst [vmem:[#allocation13] sm:$0xff] %v1315_v60  ;;  %v1318_v63 = vadd.f32 %v1513_v58, %v1317_v62  ;;  %v1730_v2 = vpop.f32.mrb[3].mxu1 }
 0x573   : > { %1322 = vst [vmem:[#allocation13 + $0x8] sm:$0xff] %v1318_v63 }
 0x574 PF: > { %p1791_p4 = scmp.eq.s32.totalorder %s2205_s17, 1  ;;  %s2128_s21 = smov [#allocation13]  }
 0x575   : > { %s1329_s29 = sshll.u32 %s2128_s21, 4  ;;  %s1330_s29 = int_to_ptr.vmem [resolvable:$true] %s1329_s29 }
 0x576   : > { %s2040_s16 = scalar_lea.vmem %s1330_s29, 256  ;;  %p2047_p9 = scmp.lt.s32.totalorder %s1330_s29, %s1330_s29 }
 0x577   : > { %p2041_p7 = scmp.ne.s32.totalorder %s1330_s29, %s2040_s16  ;;  %p2048_p10 = scmp.lt.s32.totalorder %s2040_s16, %s2040_s16 }
 0x579   : > { %p2042_p12 = pnand %p2041_p7, %p1791_p4  ;;  %p2049_p6 = por %p2048_p10, %p2047_p9 }
 0x57b   : > { %p2043_p5 = pneg %p2042_p12 }
 0x57d   : > { %p2050_p13 = pnand %p2049_p6, %p2043_p5 }
 0x57f   : > { %2053 = shalt.err (!%p2050_p13)
}
 0x580   : > { %s2746_s15 = sld [smem:[#allocation30_spill]] }
 0x586   : > { %s2747_s10 = smov %s2746_s15  ;;  %s2054_s18 = scalar_lea.hbm %s2746_s15, 256 }
 0x587   : > { %p2055_p2 = scmp.ne.s32.totalorder %s2747_s10, %s2054_s18  ;;  %p2060_p8 = scmp.lt.u32.totalorder %s2054_s18, %s2747_s10 }
 0x589   : > { %p2056_p3 = pnand %p2055_p2, %p1791_p4 }
 0x58b   : > { %p2057_p0 = pneg %p2056_p3 }
 0x58d   : > { %p2062_p11 = pnand %p2060_p8, %p2057_p0 }
 0x58f   : > { %2065 = shalt.err (!%p2062_p11)
}
 0x590   : > { %s2129_s24 = smov 128   ;;  %s2130_s22 = smov 8  }
 0x591   : > { %1765 = dma.vmem_to_hbm [thread:$0]  (%p1791_p4), %s1330_s29, 256, %s2747_s10, [#allocation6], %s2129_s24, %s2129_s24, %s2130_s22  }
 0x592   : > { %2099 = dma.done.wait (%p1791_p4), [#allocation6], 256  }
 0x593   : > { %2101 = vsyncadd (%p1791_p4), [#allocation6], 4294967040 }
 0x594 PF: > { %s2748_s16 = sld [smem:[#allocation24_spill]]  ;;  %s2749_s26 = sld [smem:[#allocation23_spill]] }
 0x595   : > { %s2750_s15 = sld [smem:[#allocation25_spill]]  ;;  %s2751_s13 = smov %s2108_s14 }
 0x59a   : > { %p25_p1 = scmp.ge.s32.totalorder %s2748_s16, 4   ;;  %s2752_s14 = smov %s2749_s26 }
 0x59c   :  { %27 = sbr.rel (!%p25_p1) target bundleno = 13 (0xd), region = 147 }
 0x5a3   :  { %1345 = vsyncpa [#allocation5], 1 }
 0x5a4   :  { %1347 = vsyncpa [#allocation5 + $0x1], 1 }
 0x5a5   :  { %1348 = vsyncpa [#allocation8], 1 }
 0x5a6   :  { %1350 = vsyncpa [#allocation8 + $0x1], 1 }
 0x5a7   :  { %1351 = vsyncpa [#allocation11], 1 }
 0x5a8   :  { %1352 = vsyncpa [#allocation6], 1 }
 0x5a9   :  { %1354 = vsyncpa [#allocation6 + $0x1], 1 }
 0x5aa   :  { %1355 = vsyncmov [#allocation3] }
 0x5ad   :  { %s1356_s17 = vpop.sfrf %1355 }
 0x5ae   :  { %p1526_p4 = scmp.ne.s32.totalorder %s1356_s17, 0 }
 0x5b0   :  { %1360 = shalt.err (%p1526_p4)  }

// kernel: tpu_custom_call.1
= control target key start
LH: loop header
LB: loop body
LE: loop exit
PB: predicated region body
PF: predicated region fallthrough
CT: control target
= control target key end

     0   :  { %s2686_s0 = inlined_call_operand.hbm [shape: f32[2,1,128], index: 0, kind: input, shape index: {}]   ;;  %s2687_s1 = inlined_call_operand.hbm [shape: bf16[2,128,128], index: 1, kind: input, shape index: {}]   ;;  %s2688_s2 = inlined_call_operand.vmem [shape: f32[2,1,128], index: 2, kind: input, shape index: {}]   ;;  %s2689_s3 = inlined_call_operand.hbm [shape: bf16[2,128,128], index: 3, kind: input, shape index: {}]   ;;  %s2690_s4 = inlined_call_operand.vmem [shape: f32[2,1,128], index: 4, kind: input, shape index: {}]   ;;  %s2691_s5 = inlined_call_operand.hbm [shape: bf16[128,128], index: 5, kind: input, shape index: {}]   ;;  %s2692_s6 = inlined_call_operand.vmem [shape: bf16[16,128], index: 6, kind: input, shape index: {}]   ;;  %s2693_s7 = inlined_call_operand.hbm [shape: bf16[128,128], index: 7, kind: input, shape index: {}]   ;;  %s2694_s8 = inlined_call_operand.vmem [shape: f32[1,128], index: 8, kind: input, shape index: {}]   ;;  %s2695_s9 = inlined_call_operand.hbm [shape: f32[128,128], index: 9, kind: input, shape index: {}]   ;;  %s2696_s10 = inlined_call_operand.hbm [shape: f32[16,128], index: 10, kind: output, shape index: {}]  }
   0x1   :  { %2712 = sst [smem:[#allocation26_spill]] %s2687_s1 }
   0x2   :  { %2713 = sst [smem:[#allocation27_spill]] %s2691_s5 }
   0x3   :  { %2714 = sst [smem:[#allocation28_spill]] %s2692_s6 }
   0x4   :  { %2715 = sst [smem:[#allocation29_spill]] %s2694_s8 }
   0x5   :  { %2716 = sst [smem:[#allocation30_spill]] %s2696_s10 }
   0x6   :  { %15 = vsyncpa [#allocation5], 0 }
   0x7   :  { %17 = vsyncpa [#allocation5 + $0x1], 0 }
   0x8   :  { %18 = vsyncpa [#allocation8], 0 }
   0x9   :  { %20 = vsyncpa [#allocation8 + $0x1], 0 }
   0xa   :  { %21 = vsyncpa [#allocation11], 0 }
   0xb   :  { %22 = vsyncpa [#allocation6], 0  ;;  %s2186_s13 = smov 0   ;;  %s2188_s14 = smov 0  }
   0xc   :  { %s2190_s15 = smov 0   ;;  %s2192_s16 = smov 0  }
   0xd LB: > { %2717 = sst [smem:[#allocation23_spill]] %s2112_s15  ;;  %s2205_s17 = sadd.s32 4294967295, %s2116_s16   ;;  %s2116_s16 = sphi %s2192_s16, %s2748_s16   ;;  %s2112_s15 = sphi %s2190_s15, %s2750_s15   ;;  %s2108_s14 = sphi %s2188_s14, %s2752_s14   ;;  %s2104_s13 = sphi %s2186_s13, %s2751_s13  }
   0xe   : > { %s2208_s18 = sadd.s32 1, %s2116_s16   ;;  %s35_s20 = sadd.s32 1, %s2112_s15 }
   0xf   : > { %2718 = sst [smem:[#allocation24_spill]] %s2208_s18  ;;  %s32_s19 = ssub.s32 %s2116_s16, %s2208_s18 }
  0x10   : > { %p33_p0 = scmp.eq.s32.totalorder %s32_s19, 0  ;;  %p42_p1 = scmp.ne.s32.totalorder %s2112_s15, %s2108_s14 }
  0x11   : > { %p43_p2 = scmp.eq.s32.totalorder %s2116_s16, 0  ;;  %p48_p3 = scmp.ne.s32.totalorder %s2108_s14, %s2104_s13 }
  0x12   : > { %s2218_s21 = scalar_select %p33_p0, %s2112_s15, %s35_s20  }
  0x13   : > { %p2220_p4 = por %p43_p2, %p42_p1  ;;  %p2697_p5 = scmp.eq.s32.totalorder %s2205_s17, 0 }
  0x14   : > { %2719 = sst [smem:[#allocation25_spill]] %s2218_s21  ;;  %p1466_p6 = scmp.ge.s32.totalorder %s2116_s16, 1 }
  0x15   : > { %p268_p7 = scmp.lt.s32.totalorder %s2116_s16, 3  ;;  %p2229_p8 = por %p2697_p5, %p48_p3 }
  0x16   : > { %s2118_s25 = smov [#allocation10]   ;;  %p1787_p12 = scmp.lt.s32.totalorder %s2116_s16, 2 }
  0x17   : > { %s2721_s23 = scalar_select %p2229_p8, 1, 0 }
  0x18   : > { %p2233_p9 = pnand %p1466_p6, %p268_p7  ;;  %s280_s26 = sshll.u32 %s2118_s25, 4  ;;  %s281_s26 = int_to_ptr.vmem [resolvable:$true] %s280_s26 }
  0x19   : > { %s2247_s28 = sand.u32 1, %s2112_s15   ;;  %p2252_p13 = pnand %p1787_p12, %p2220_p4 }
  0x1a   : > { %s2722_s24 = scalar_select %p2233_p9, 1, 0 }
  0x1b   : > { %p1768_p10 = pneg %p2233_p9  ;;  %s2725_s5 = sld [smem:[#allocation27_spill]] }
  0x1c   : > { %s2724_s30 = scalar_select %p2252_p13, 1, 0 }
  0x1d   : > { %p2241_p11 = pnand %p1768_p10, %p2697_p5 }
  0x1f   : > { %s2723_s27 = scalar_select %p2241_p11, 1, 0 }
  0x20   : > { %p2706_p1 = pneg %p2241_p11 }
  0x21   : > { %s1868_s13 = scalar_lea.hbm %s2725_s5, 1024 }
  0x22   : > { %p1869_p0 = scmp.ne.s32.totalorder %s2725_s5, %s1868_s13  ;;  %p1875_p4 = scmp.lt.u32.totalorder %s1868_s13, %s2725_s5 }
  0x24   : > { %p1871_p2 = pnand %p2706_p1, %p1869_p0 }
  0x26   : > { %p1872_p3 = pneg %p1871_p2 }
  0x28   : > { %p1877_p6 = pnand %p1875_p4, %p1872_p3 }
  0x2a   : > { %1880 = shalt.err (!%p1877_p6)
}
  0x2b   : > { %s1881_s29 = scalar_lea.vmem %s281_s26, 1024  ;;  %p1889_p5 = scmp.lt.s32.totalorder %s281_s26, %s281_s26 }
  0x2c   : > { %p1882_p7 = scmp.ne.s32.totalorder %s281_s26, %s1881_s29  ;;  %p1890_p8 = scmp.lt.s32.totalorder %s1881_s29, %s1881_s29 }
  0x2e   : > { %p1884_p10 = pnand %p1882_p7, %p2706_p1  ;;  %p1891_p9 = por %p1890_p8, %p1889_p5 }
  0x30   : > { %p1885_p12 = pneg %p1884_p10 }
  0x32   : > { %p1892_p13 = pnand %p1891_p9, %p1885_p12 }
  0x34   : > { %1895 = shalt.err (!%p1892_p13)
}
  0x35   : > { %s2119_s11 = smov 64   ;;  %s2120_s12 = smov 4  }
  0x36   : > { %1771 = dma.hbm_to_vmem [thread:$0]  (!%p2241_p11), %s2725_s5, 1024, %s281_s26, [#allocation11], %s2119_s11, %s2119_s11, %s2120_s12  }
  0x37   : > { %s2705_s29 = sshll.u32 %s2247_s28, 6  ;;  %s1527_s20 = sshll.u32 %s2116_s16, 10 }
  0x38   : > { %s2726_s1 = sld [smem:[#allocation26_spill]]  ;;  %s334_s15 = scalar_lea.vmem [#allocation7], %s2705_s29 }
  0x39   : > { %s341_s18 = sshll.u32 %s334_s15, 4  ;;  %s2295_s26 = scalar_lea.hbm %s2689_s3, %s1527_s20  ;;  %s2290_s18 = int_to_ptr.vmem [resolvable:$true] %s341_s18 }
  0x3a   : > { %s2727_s13 = sand.u32 1, %s2116_s16   ;;  %p2728_p8 = scmp.ne.s32.totalorder %s2724_s30, 0 }
  0x3b   : > { %s2299_s19 = scalar_lea.sflag [#allocation8], %s2727_s13 }
  0x3c   : > { %p2305_p9 = pneg %p2728_p8 }
  0x3e   : > { %s2286_s21 = scalar_lea.hbm %s2726_s1, %s1527_s20  ;;  %s1901_s8 = scalar_lea.hbm %s2726_s1, 2048 }
  0x3f   : > { %s1896_s25 = scalar_lea.hbm %s2286_s21, 1024  ;;  %p1902_p2 = scmp.lt.u32.totalorder %s2286_s21, %s2726_s1 }
  0x40   : > { %p1897_p5 = scmp.ne.s32.totalorder %s2286_s21, %s1896_s25  ;;  %p1903_p3 = scmp.lt.u32.totalorder %s1901_s8, %s1896_s25 }
  0x41   : > { %s2729_s22 = scalar_select %p2305_p9, 1, 0 }
  0x42   : > { %p1899_p13 = pnand %p2305_p9, %p1897_p5  ;;  %p1904_p4 = por %p1903_p3, %p1902_p2 }
  0x43   : > { %p1905_p6 = scmp.lt.u32.totalorder %s1896_s25, %s2286_s21 }
  0x44   : > { %p1900_p0 = pneg %p1899_p13 }
  0x45   : > { %p1906_p7 = por %p1905_p6, %p1904_p4 }
  0x47   : > { %p1907_p10 = pnand %p1906_p7, %p1900_p0 }
  0x49   : > { %1910 = shalt.err (!%p1907_p10)
}
  0x4a   : > { %s1911_s13 = scalar_lea.vmem %s2290_s18, 1024  ;;  %s2121_s29 = smov [#allocation7]  }
  0x4b   : > { %p1912_p12 = scmp.ne.s32.totalorder %s2290_s18, %s1911_s13  ;;  %s1916_s15 = sshll.u32 %s2121_s29, 4  ;;  %s1917_s15 = int_to_ptr.vmem [resolvable:$false] %s1916_s15 }
  0x4c   : > { %s1918_s10 = scalar_lea.vmem %s1917_s15, 2048  ;;  %p1919_p1 = scmp.lt.s32.totalorder %s2290_s18, %s1917_s15 }
  0x4d   : > { %p1914_p5 = pnand %p1912_p12, %p2305_p9  ;;  %p1920_p11 = scmp.lt.s32.totalorder %s1918_s10, %s1911_s13 }
  0x4f   : > { %p1915_p13 = pneg %p1914_p5  ;;  %p1921_p2 = por %p1920_p11, %p1919_p1 }
  0x51   : > { %p1922_p3 = pnand %p1921_p2, %p1915_p13 }
  0x53   : > { %1925 = shalt.err (!%p1922_p3)
}
  0x54   : > { %1781 = dma.hbm_to_vmem [thread:$0]  (!%p2728_p8), %s2286_s21, 1024, %s2290_s18, %s2299_s19, %s2119_s11, %s2119_s11, %s2120_s12  }
  0x55   : > { %s2730_s25 = sshll.u32 %s2247_s28, 6  ;;  %s2122_s13 = smov [#allocation12]  }
  0x56   : > { %s361_s8 = scalar_lea.vmem [#allocation9], %s2730_s25  ;;  %s296_s29 = sshll.u32 %s2122_s13, 4  ;;  %s297_s29 = int_to_ptr.vmem [resolvable:$true] %s296_s29 }
  0x57   : > { %s368_s20 = sshll.u32 %s361_s8, 4  ;;  %s1926_s1 = scalar_lea.hbm %s2693_s7, 1024  ;;  %s2334_s20 = int_to_ptr.vmem [resolvable:$true] %s368_s20 }
  0x58   : > { %p1927_p11 = scmp.ne.s32.totalorder %s2693_s7, %s1926_s1  ;;  %p2731_p1 = scmp.ne.s32.totalorder %s2723_s27, 0 }
  0x59   : > { %p1933_p7 = scmp.lt.u32.totalorder %s1926_s1, %s2693_s7 }
  0x5a   : > { %p2732_p0 = pneg %p2731_p1 }
  0x5c   : > { %p1929_p4 = pnand %p1927_p11, %p2732_p0 }
  0x5e   : > { %p1930_p6 = pneg %p1929_p4 }
  0x60   : > { %p1935_p10 = pnand %p1933_p7, %p1930_p6 }
  0x62   : > { %1938 = shalt.err (!%p1935_p10)
}
  0x63   : > { %s1939_s25 = scalar_lea.vmem %s297_s29, 1024  ;;  %p2733_p5 = pmov %p2732_p0 }
  0x64   : > { %p1940_p12 = scmp.ne.s32.totalorder %s297_s29, %s1939_s25  ;;  %p1947_p3 = scmp.lt.s32.totalorder %s297_s29, %s297_s29 }
  0x65   : > { %p1948_p8 = scmp.lt.s32.totalorder %s1939_s25, %s1939_s25 }
  0x66   : > { %p1942_p13 = pnand %p1940_p12, %p2733_p5 }
  0x67   : > { %p1949_p9 = por %p1948_p8, %p1947_p3 }
  0x68   : > { %p1943_p2 = pneg %p1942_p13 }
  0x6a   : > { %p1950_p0 = pnand %p1949_p9, %p1943_p2 }
  0x6c   : > { %1953 = shalt.err (!%p1950_p0)
}
  0x6d   : > { %1774 = dma.hbm_to_vmem [thread:$0]  (!%p2731_p1), %s2693_s7, 1024, %s297_s29, [#allocation11], %s2119_s11, %s2119_s11, %s2120_s12  }
  0x6e   : > { %s1470_s6 = sshll.u32 %s2116_s16, 4  ;;  %s316_s27 = scalar_lea.vmem [#allocation4], %s2247_s28 }
  0x6f   : > { %s2363_s15 = scalar_lea.hbm %s2686_s0, %s1470_s6  ;;  %s323_s10 = sshll.u32 %s316_s27, 4  ;;  %s324_s10 = int_to_ptr.vmem [resolvable:$true] %s323_s10 }
  0x70   : > { %s314_s18 = scalar_lea.sflag [#allocation5], %s2247_s28  ;;  %s1954_s21 = scalar_lea.hbm %s2363_s15, 16 }
  0x71   : > { %p1955_p8 = scmp.ne.s32.totalorder %s2363_s15, %s1954_s21  ;;  %p2734_p9 = scmp.ne.s32.totalorder %s2729_s22, 0 }
  0x72   : > { %s1959_s25 = scalar_lea.hbm %s2686_s0, 32  ;;  %p1960_p1 = scmp.lt.u32.totalorder %s2363_s15, %s2686_s0 }
  0x73   : > { %p1957_p11 = pnand %p1955_p8, %p2734_p9  ;;  %p1961_p6 = scmp.lt.u32.totalorder %s1959_s25, %s1954_s21 }
  0x74   : > { %p1963_p10 = scmp.lt.u32.totalorder %s1954_s21, %s2363_s15 }
  0x75   : > { %p1958_p4 = pneg %p1957_p11  ;;  %p1962_p7 = por %p1961_p6, %p1960_p1 }
  0x77   : > { %p1964_p12 = por %p1963_p10, %p1962_p7 }
  0x79   : > { %p1965_p5 = pnand %p1964_p12, %p1958_p4 }
  0x7b   : > { %1968 = shalt.err (!%p1965_p5)
}
  0x7c   : > { %s1969_s28 = scalar_lea.vmem %s324_s10, 16  ;;  %s2123_s6 = smov [#allocation4]  }
  0x7d   : > { %p1970_p13 = scmp.ne.s32.totalorder %s324_s10, %s1969_s28  ;;  %s1974_s8 = sshll.u32 %s2123_s6, 4  ;;  %s1975_s8 = int_to_ptr.vmem [resolvable:$false] %s1974_s8 }
  0x7e   : > { %s1976_s13 = scalar_lea.vmem %s1975_s8, 32  ;;  %p1977_p0 = scmp.lt.s32.totalorder %s324_s10, %s1975_s8 }
  0x7f   : > { %p1972_p2 = pnand %p1970_p13, %p2734_p9  ;;  %p1978_p8 = scmp.lt.s32.totalorder %s1976_s13, %s1969_s28 }
  0x81   : > { %p1973_p3 = pneg %p1972_p2  ;;  %p1979_p11 = por %p1978_p8, %p1977_p0 }
  0x83   : > { %p1980_p1 = pnand %p1979_p11, %p1973_p3 }
  0x85   : > { %1983 = shalt.err (!%p1980_p1)
}
  0x86   : > { %p2735_p6 = scmp.ne.s32.totalorder %s2724_s30, 0  ;;  %s1984_s27 = scalar_lea.hbm %s2295_s26, 1024 }
  0x87   : > { %p1985_p4 = scmp.ne.s32.totalorder %s2295_s26, %s1984_s27  ;;  %s1989_s16 = scalar_lea.hbm %s2689_s3, 2048 }
  0x88   : > { %1778 = dma.hbm_to_vmem [thread:$0]  (!%p2735_p6), %s2363_s15, 16, %s324_s10, %s314_s18  }
  0x89   : > { %p1987_p7 = pnand %p1985_p4, %p2734_p9  ;;  %p1990_p12 = scmp.lt.u32.totalorder %s2295_s26, %s2689_s3 }
  0x8a   : > { %p1991_p5 = scmp.lt.u32.totalorder %s1989_s16, %s1984_s27  ;;  %p1993_p2 = scmp.lt.u32.totalorder %s1984_s27, %s2295_s26 }
  0x8b   : > { %p1988_p10 = pneg %p1987_p7 }
  0x8c   : > { %p1992_p13 = por %p1991_p5, %p1990_p12 }
  0x8e   : > { %p1994_p3 = por %p1993_p2, %p1992_p13 }
  0x90   : > { %p1995_p0 = pnand %p1994_p3, %p1988_p10 }
  0x92   : > { %1998 = shalt.err (!%p1995_p0)
}
  0x93   : > { %s1999_s15 = scalar_lea.vmem %s2334_s20, 1024  ;;  %s2124_s10 = smov [#allocation9]  }
  0x94   : > { %p2000_p8 = scmp.ne.s32.totalorder %s2334_s20, %s1999_s15  ;;  %s2004_s18 = sshll.u32 %s2124_s10, 4  ;;  %s2005_s18 = int_to_ptr.vmem [resolvable:$false] %s2004_s18 }
  0x95   : > { %s2006_s5 = scalar_lea.vmem %s2005_s18, 2048  ;;  %p2007_p4 = scmp.lt.s32.totalorder %s2334_s20, %s2005_s18 }
  0x96   : > { %p2002_p11 = pnand %p2000_p8, %p2734_p9  ;;  %p2008_p7 = scmp.lt.s32.totalorder %s2006_s5, %s1999_s15 }
  0x98   : > { %p2003_p1 = pneg %p2002_p11  ;;  %p2009_p12 = por %p2008_p7, %p2007_p4 }
  0x9a   : > { %p2010_p5 = pnand %p2009_p12, %p2003_p1 }
  0x9c   : > { %2013 = shalt.err (!%p2010_p5)
}
  0x9d   : > { %1784 = dma.hbm_to_vmem [thread:$0]  (!%p2735_p6), %s2295_s26, 1024, %s2334_s20, %s2299_s19, %s2119_s11, %s2119_s11, %s2120_s12  }
  0x9e   : > { %p2736_p9 = scmp.ne.s32.totalorder %s2722_s24, 0 }
  0x9f   : > { %s2412_s22 = sand.u32 (!%p2736_p9), 1, %s2108_s14   ;;  %p2737_p10 = scmp.ne.s32.totalorder (!%p2736_p9), %s2721_s23, 0 }
  0xa0   : > { %386 = sbr.rel (%p2736_p9) target bundleno = 1428 (0x594), region = 56  ;;  %s389_s28 = scalar_lea.sflag (!%p2736_p9), [#allocation5], %s2412_s22 }
  0xa1   : > { %s391_s6 = scalar_lea.vmem (!%p2736_p9), [#allocation4], %s2412_s22 }
  0xa7   : > { %2083 = dma.done.wait (%p2737_p10), %s389_s28, 16  }
  0xa8   : > { %2085 = vsyncadd (%p2737_p10), %s389_s28, 4294967280  ;;  %s396_s30 = sand.u32 1, %s2205_s17   ;;  %s1478_s11 = sshll.u32 %s2412_s22, 6 }
  0xa9   : > { %s397_s24 = scalar_lea.sflag [#allocation8], %s396_s30  ;;  %s2422_s12 = scalar_lea.vmem [#allocation7], %s1478_s11 }
  0xaa   : > { %2087 = dma.done.wait (%p2737_p10), %s397_s24, 2048  }
  0xab   : > { %2089 = vsyncadd (%p2737_p10), %s397_s24, 4294965248  ;;  %s2428_s26 = scalar_lea.vmem [#allocation9], %s1478_s11  ;;  %p2738_p6 = scmp.eq.s32.totalorder %s2205_s17, 0 }
  0xad   : > { %2091 = dma.done.wait (%p2738_p6), [#allocation11], 2048   ;;  %p2739_p13 = pmov %p2738_p6 }
  0xae   : > { %p462_p2 = scmp.lt.s32.totalorder %s2205_s17, 1  ;;  %s2125_s19 = smov [#allocation2]  }
  0xaf   : > { %2093 = vsyncadd (%p2739_p13), [#allocation11], 4294965248  ;;  %s480_s20 = sshll.u32 %s2125_s19, 4  ;;  %s2014_s15 = scalar_lea.hbm %s2695_s9, 2048  ;;  %s481_s20 = int_to_ptr.vmem [resolvable:$true] %s480_s20 }
  0xb0   : > { %s2436_s8 = scalar_select %p462_p2, %s2205_s17, 1 }
  0xb1   : > { %p2015_p3 = scmp.ne.s32.totalorder %s2695_s9, %s2014_s15  ;;  %p2740_p0 = pmov %p2738_p6 }
  0xb2   : > { %s464_s27 = scalar_lea.vmem %s2688_s2, %s2436_s8  ;;  %s467_s16 = scalar_lea.vmem %s2690_s4, %s2436_s8 }
  0xb3   : > { %p2016_p8 = pnand %p2015_p3, %p2740_p0  ;;  %p2020_p1 = scmp.lt.u32.totalorder %s2014_s15, %s2695_s9 }
  0xb5   : > { %p2017_p11 = pneg %p2016_p8 }
  0xb7   : > { %p2022_p4 = pnand %p2020_p1, %p2017_p11 }
  0xb9   : > { %2025 = shalt.err (!%p2022_p4)  }
  0xba   : > { %s2026_s30 = scalar_lea.vmem %s481_s20, 2048  ;;  %p2741_p12 = pmov %p2740_p0 }
  0xbb   : > { %p2027_p7 = scmp.ne.s32.totalorder %s481_s20, %s2026_s30  ;;  %p2033_p10 = scmp.lt.s32.totalorder %s481_s20, %s481_s20 }
  0xbc   : > { %p2034_p6 = scmp.lt.s32.totalorder %s2026_s30, %s2026_s30 }
  0xbd   : > { %p2028_p5 = pnand %p2027_p7, %p2741_p12 }
  0xbe   : > { %p2035_p13 = por %p2034_p6, %p2033_p10 }
  0xbf   : > { %p2029_p9 = pneg %p2028_p5 }
  0xc1   : > { %p2036_p2 = pnand %p2035_p13, %p2029_p9 }
  0xc3   : > { %2039 = shalt.err (!%p2036_p2)  }
  0xc4   : > { %p2742_p3 = pmov %p2740_p0 }
  0xc6   : > { %1762 = dma.hbm_to_vmem [thread:$0]  (%p2742_p3), %s2695_s9, 2048, %s481_s20, [#allocation3] }
  0xc7   : > { %2095 = dma.done.wait (%p2740_p0), [#allocation3], 2048  ;;  %p2743_p8 = pmov %p2740_p0 }
  0xc8   : > { %v2468_v0 = vld [vmem:[#allocation2] sm:$0xff]  ;;  %v2470_v1 = vld [vmem:[#allocation2 + $0x8] sm:$0xff]  ;;  %v2472_v2 = vld [vmem:[#allocation2 + $0x10] sm:$0xff]  ;;  %p1510_p11 = scmp.ge.s32.totalorder %s2205_s17, 1 }
  0xc9   : > { %2097 = vsyncadd (%p2743_p8), [#allocation3], 4294965248  ;;  %v519_v3 = vpack.c.bf16 %v2470_v1, %v2468_v0  ;;  %v2476_v4 = vld [vmem:[#allocation2 + $0x18] sm:$0xff]  ;;  %v2480_v6 = vld [vmem:[#allocation2 + $0x20] sm:$0xff] }
  0xca   : > { %v520_v5 = vpack.c.bf16 %v2476_v4, %v2472_v2  ;;  %v2482_v7 = vld [vmem:[#allocation2 + $0x28] sm:$0xff]  ;;  %v2484_v8 = vld [vmem:[#allocation2 + $0x30] sm:$0xff]  ;;  %v2488_v10 = vld [vmem:[#allocation2 + $0x38] sm:$0xff] }
  0xcb   : > { %1595 = vmatprep.subr.bf16.mxu0 %v519_v3  ;;  %v521_v9 = vpack.c.bf16 %v2482_v7, %v2480_v6  ;;  %v1835_v11 = vld [vmem:[#allocation10] sm:$0xff]   ;;  %v522_v12 = vpack.c.bf16 %v2488_v10, %v2484_v8  ;;  %v2496_v15 = vld [vmem:[#allocation2 + $0x50] sm:$0xff]  ;;  %v2500_v17 = vld [vmem:[#allocation2 + $0x58] sm:$0xff] }
  0xcc   : > { %1596 = vmatpush3.bf16.msra.mxu0 %v519_v3  ;;  %1611 = vmatprep.mubr.bf16.mxu0 %v1835_v11  ;;  %v2492_v13 = vld [vmem:[#allocation2 + $0x40] sm:$0xff]  ;;  %v2494_v14 = vld [vmem:[#allocation2 + $0x48] sm:$0xff]  ;;  %v524_v21 = vpack.c.bf16 %v2500_v17, %v2496_v15  ;;  %v1845_v23 = vld [vmem:[%s2422_s12 + $0x10] sm:$0xff]  }
  0xcd   : > { %1597 = vmatprep.subr.bf16.mxu0 %v520_v5  ;;  %v523_v16 = vpack.c.bf16 %v2494_v14, %v2492_v13  ;;  %v1843_v18 = vld [vmem:[%s2422_s12] sm:$0xff]   ;;  %v1844_v19 = vld [vmem:[%s2422_s12 + $0x8] sm:$0xff]   ;;  %v2513_v25 = vld [vmem:[#allocation2 + $0x78] sm:$0xff] }
  0xce   : > { %v2504_v20 = vld [vmem:[#allocation2 + $0x60] sm:$0xff]  ;;  %1627 = vmatprep.subr.bf16.mxu1 %v1843_v18  ;;  %v2508_v22 = vld [vmem:[#allocation2 + $0x68] sm:$0xff]  ;;  %v2511_v24 = vld [vmem:[#allocation2 + $0x70] sm:$0xff] }
  0xcf   : > { %1628 = vmatpush3.bf16.msra.mxu1 %v1843_v18  ;;  %v1846_v26 = vld [vmem:[%s2422_s12 + $0x18] sm:$0xff]   ;;  %v525_v27 = vpack.c.bf16 %v2508_v22, %v2504_v20  ;;  %v526_v28 = vpack.c.bf16 %v2513_v25, %v2511_v24  ;;  %v1847_v29 = vld [vmem:[%s2422_s12 + $0x20] sm:$0xff]   ;;  %v1848_v30 = vld [vmem:[%s2422_s12 + $0x28] sm:$0xff]  }
  0xd0   : > { %1598 = vmatpush3.bf16.msra.mxu0 %v520_v5  ;;  %1629 = vmatprep.subr.bf16.mxu1 %v1844_v19  ;;  %v1836_v31 = vld [vmem:[#allocation10 + $0x8] sm:$0xff]   ;;  %v1837_v32 = vld [vmem:[#allocation10 + $0x10] sm:$0xff]   ;;  %v1838_v33 = vld [vmem:[#allocation10 + $0x18] sm:$0xff]  }
  0xd1   : > { %1599 = vmatprep.subr.bf16.mxu0 %v521_v9  ;;  %v1839_v34 = vld [vmem:[#allocation10 + $0x20] sm:$0xff]   ;;  %v1840_v35 = vld [vmem:[#allocation10 + $0x28] sm:$0xff]   ;;  %v1841_v36 = vld [vmem:[#allocation10 + $0x30] sm:$0xff]  }
  0xd2   : > { %v1842_v37 = vld [vmem:[#allocation10 + $0x38] sm:$0xff]   ;;  %v1849_v38 = vld [vmem:[%s2422_s12 + $0x30] sm:$0xff]   ;;  %v1851_v40 = vld [vmem:[%s2428_s26] sm:$0xff]  }
  0xd3   : > { %1630 = vmatpush3.bf16.msra.mxu1 %v1844_v19  ;;  %v1850_v39 = vld [vmem:[%s2422_s12 + $0x38] sm:$0xff]   ;;  %v1852_v41 = vld [vmem:[%s2428_s26 + $0x8] sm:$0xff]   ;;  %v1853_v42 = vld [vmem:[%s2428_s26 + $0x10] sm:$0xff]  }
  0xd4   : > { %1600 = vmatpush3.bf16.msra.mxu0 %v521_v9  ;;  %1631 = vmatprep.subr.bf16.mxu1 %v1845_v23  ;;  %v2528_v43 = vld [vmem:[%s2428_s26 + $0x18] sm:$0xff]   ;;  %v2532_v44 = vld [vmem:[%s2428_s26 + $0x20] sm:$0xff]   ;;  %v2537_v45 = vld [vmem:[%s2428_s26 + $0x28] sm:$0xff]  }
  0xd5   : > { %1601 = vmatprep.subr.bf16.mxu0 %v522_v12  ;;  %v1491_v46 = vld [vmem:[%s391_s6] ss:$0 sm:$0xff] }
  0xd6   : > { %v681_v47 = vmul.f32 %v1491_v46, %v2472_v2  ;;  %v682_v48 = vmul.f32 %v1491_v46, %v2476_v4  ;;  %v679_v50 = vmul.f32 %v1491_v46, %v2468_v0  ;;  %v680_v51 = vmul.f32 %v1491_v46, %v2470_v1 }
  0xd7   : > { %1632 = vmatpush3.bf16.msra.mxu1 %v1845_v23  ;;  %v685_v61 = vmul.f32 %v1491_v46, %v2484_v8  ;;  %v686_v62 = vmul.f32 %v1491_v46, %v2488_v10  ;;  %v683_v2 = vmul.f32 %v1491_v46, %v2480_v6  ;;  %v684_v0 = vmul.f32 %v1491_v46, %v2482_v7 }
  0xd8   : > { %1602 = vmatpush3.bf16.msra.mxu0 %v522_v12  ;;  %1633 = vmatprep.subr.bf16.mxu1 %v1846_v26  ;;  %v689_v10 = vmul.f32 %v1491_v46, %v2496_v15  ;;  %v690_v18 = vmul.f32 %v1491_v46, %v2500_v17  ;;  %v687_v7 = vmul.f32 %v1491_v46, %v2492_v13 }
  0xd9   : > { %1603 = vmatprep.subr.bf16.mxu0 %v523_v16  ;;  %v688_v19 = vmul.f32 %v1491_v46, %v2494_v14  ;;  %v694_v13 = vmul.f32 %v1491_v46, %v2513_v25 }
  0xdb   : > { %1634 = vmatpush3.bf16.msra.mxu1 %v1846_v26 }
  0xdc   : > { %1604 = vmatpush3.bf16.msra.mxu0 %v523_v16  ;;  %1635 = vmatprep.subr.bf16.mxu1 %v1847_v29 }
  0xdd   : > { %1605 = vmatprep.subr.bf16.mxu0 %v524_v21 }
  0xdf   : > { %1636 = vmatpush3.bf16.msra.mxu1 %v1847_v29 }
  0xe0   : > { %1606 = vmatpush3.bf16.msra.mxu0 %v524_v21  ;;  %1637 = vmatprep.subr.bf16.mxu1 %v1848_v30 }
  0xe1   : > { %1607 = vmatprep.subr.bf16.mxu0 %v525_v27 }
  0xe3   : > { %1638 = vmatpush3.bf16.msra.mxu1 %v1848_v30 }
  0xe4   : > { %1608 = vmatpush3.bf16.msra.mxu0 %v525_v27  ;;  %1639 = vmatprep.subr.bf16.mxu1 %v1849_v38 }
  0xe5   : > { %1609 = vmatprep.subr.bf16.mxu0 %v526_v28 }
  0xe7   : > { %1640 = vmatpush3.bf16.msra.mxu1 %v1849_v38 }
  0xe8   : > { %1610 = vmatpush3.bf16.msra.mxu0 %v526_v28  ;;  %1641 = vmatprep.subr.bf16.mxu1 %v1850_v39 }
  0xe9   : > { %1659 = vmatprep.subr.bf16.mxu0 %v1851_v40 }
  0xeb   : > { %1612 = vmatmul.mubr.bf16.vlgmr.msra.gmra.mrb[0].mxu0 %v1836_v31  ;;  %1642 = vmatpush3.bf16.msra.mxu1 %v1850_v39  ;;  %v693_v31 = vmul.f32 %v1491_v46, %v2511_v24 }
  0xec   : > { %1615 = vmatprep.mubr.bf16.mxu0 %v1837_v32  ;;  %1731 = vmatprep.subr.bf16.mxu1 %v1851_v40  ;;  %v691_v32 = vmul.f32 %v1491_v46, %v2504_v20  ;;  %v1857_v20 = vld [vmem:[%s2428_s26 + $0x30] sm:$0xff]  }
  0xed   : > { %1660 = vmatpush3.bf16.msra.mxu0 %v1851_v40 }
  0xee   : > { %1661 = vmatprep.subr.bf16.mxu0 %v1852_v41 }
  0xf1   : > { %1662 = vmatpush3.bf16.msra.mxu0 %v1852_v41 }
  0xf2   : > { %1663 = vmatprep.subr.bf16.mxu0 %v1853_v42 }
  0xf3   : > { %1616 = vmatmul.mubr.bf16.gmra.mrb[4].mxu0 %v1838_v33  ;;  %v692_v33 = vmul.f32 %v1491_v46, %v2508_v22  ;;  %v1858_v22 = vld [vmem:[%s2428_s26 + $0x38] sm:$0xff]  }
  0xf4   : > { %1619 = vmatprep.mubr.bf16.mxu0 %v1839_v34 }
  0xf5   : > { %1664 = vmatpush3.bf16.msra.mxu0 %v1853_v42 }
  0xf6   : > { %1665 = vmatprep.subr.bf16.mxu0 %v2528_v43 }
  0xf9   : > { %1666 = vmatpush3.bf16.msra.mxu0 %v2528_v43 }
  0xfa   : > { %1667 = vmatprep.subr.bf16.mxu0 %v2532_v44 }
  0xfb   : > { %1620 = vmatmul.mubr.bf16.gmra.mrb[8].mxu0 %v1840_v35 }
  0xfc   : > { %1623 = vmatprep.mubr.bf16.mxu0 %v1841_v36 }
  0xfd   : > { %1668 = vmatpush3.bf16.msra.mxu0 %v2532_v44 }
  0xfe   : > { %1669 = vmatprep.subr.bf16.mxu0 %v2537_v45 }
 0x101   : > { %1670 = vmatpush3.bf16.msra.mxu0 %v2537_v45 }
 0x102   : > { %1671 = vmatprep.subr.bf16.mxu0 %v1857_v20 }
 0x103   : > { %1624 = vmatmul.mubr.bf16.gmra.mrb[12].mxu0 %v1842_v37 }
 0x105   : > { %1672 = vmatpush3.bf16.msra.mxu0 %v1857_v20 }
 0x106   : > { %1673 = vmatprep.subr.bf16.mxu0 %v1858_v22 }
 0x109   : > { %1674 = vmatpush3.bf16.msra.mxu0 %v1858_v22 }
 0x1be   : > { %v1613_v49 = vpop.f32.mrb[0].mxu0 }
 0x1bf   : > { %v609_v52 = vpop.f32.mrb[1].mxu0  ;;  %v697_v54 = vadd.f32 %v1613_v49, %v681_v47 }
 0x1c0   : > { %v1614_v53 = vpop.f32.mrb[2].mxu0  ;;  %v695_v57 = vadd.f32 %v679_v50, %v609_v52 }
 0x1c1   : > { %v698_v55 = vadd.f32 %v1614_v53, %v682_v48  ;;  %v612_v56 = vpop.f32.mrb[3].mxu0 }
 0x1c2   : > { %v696_v58 = vadd.f32 %v680_v51, %v612_v56 }
 0x1c3   : > { %v712_v59 = vpack.c.bf16 %v698_v55, %v697_v54 }
 0x1c4   : > { %v711_v60 = vpack.c.bf16 %v696_v58, %v695_v57 }
 0x1c6   : > { %v1617_v63 = vpop.f32.mrb[4].mxu0  ;;  %1643 = vmatprep.mubr.bf16.mxu1 %v711_v60 }
 0x1c7   : > { %v625_v1 = vpop.f32.mrb[5].mxu0  ;;  %1644 = vmatmul.mubr.bf16.vlgmr.msra.gmra.mrb[0].mxu1 %v712_v59  ;;  %v701_v4 = vadd.f32 %v1617_v63, %v685_v61 }
 0x1c8   : > { %v1618_v3 = vpop.f32.mrb[6].mxu0  ;;  %1739 = vmatpush3.bf16.msra.mxu1 %v1851_v40  ;;  %v699_v11 = vadd.f32 %v683_v2, %v625_v1 }
 0x1c9   : > { %v702_v5 = vadd.f32 %v1618_v3, %v686_v62  ;;  %v628_v9 = vpop.f32.mrb[7].mxu0  ;;  %1732 = vmatprep.subr.bf16.mxu1 %v1852_v41 }
 0x1ca   : > { %v700_v12 = vadd.f32 %v684_v0, %v628_v9 }
 0x1cb   : > { %v714_v16 = vpack.c.bf16 %v702_v5, %v701_v4 }
 0x1cc   : > { %v713_v8 = vpack.c.bf16 %v700_v12, %v699_v11  ;;  %1740 = vmatpush3.bf16.msra.mxu1 %v1852_v41  ;;  %v1492_v41 = vld [vmem:[%s464_s27] ss:$0 sm:$0xff] }
 0x1cd   : > { %1733 = vmatprep.subr.bf16.mxu1 %v1853_v42 }
 0x1ce   : > { %v1621_v6 = vpop.f32.mrb[8].mxu0  ;;  %1647 = vmatprep.mubr.bf16.mxu1 %v713_v8 }
 0x1cf   : > { %v641_v21 = vpop.f32.mrb[9].mxu0  ;;  %1648 = vmatmul.mubr.bf16.gmra.mrb[4].mxu1 %v714_v16  ;;  %v705_v26 = vadd.f32 %v1621_v6, %v689_v10 }
 0x1d0   : > { %v1622_v23 = vpop.f32.mrb[10].mxu0  ;;  %1741 = vmatpush3.bf16.msra.mxu1 %v1853_v42  ;;  %v703_v29 = vadd.f32 %v687_v7, %v641_v21 }
 0x1d1   : > { %v706_v27 = vadd.f32 %v1622_v23, %v690_v18  ;;  %v644_v28 = vpop.f32.mrb[11].mxu0  ;;  %1734 = vmatprep.subr.bf16.mxu1 %v2528_v43 }
 0x1d2   : > { %v704_v15 = vadd.f32 %v688_v19, %v644_v28 }
 0x1d3   : > { %v716_v30 = vpack.c.bf16 %v706_v27, %v705_v26 }
 0x1d4   : > { %v715_v17 = vpack.c.bf16 %v704_v15, %v703_v29  ;;  %1742 = vmatpush3.bf16.msra.mxu1 %v2528_v43 }
 0x1d5   : > { %1735 = vmatprep.subr.bf16.mxu1 %v2532_v44 }
 0x1d6   : > { %v1625_v14 = vpop.f32.mrb[12].mxu0  ;;  %1651 = vmatprep.mubr.bf16.mxu1 %v715_v17 }
 0x1d7   : > { %v657_v34 = vpop.f32.mrb[13].mxu0  ;;  %1652 = vmatmul.mubr.bf16.gmra.mrb[8].mxu1 %v716_v30  ;;  %v709_v36 = vadd.f32 %v1625_v14, %v693_v31 }
 0x1d8   : > { %v1626_v35 = vpop.f32.mrb[14].mxu0  ;;  %1743 = vmatpush3.bf16.msra.mxu1 %v2532_v44  ;;  %v707_v25 = vadd.f32 %v691_v32, %v657_v34 }
 0x1d9   : > { %v710_v37 = vadd.f32 %v1626_v35, %v694_v13  ;;  %v660_v24 = vpop.f32.mrb[15].mxu0  ;;  %1736 = vmatprep.subr.bf16.mxu1 %v2537_v45 }
 0x1da   : > { %v708_v38 = vadd.f32 %v692_v33, %v660_v24  ;;  %v1501_v24 = vld [vmem:[%s467_s16] ss:$0 sm:$0xff] }
 0x1db   : > { %v718_v39 = vpack.c.bf16 %v710_v37, %v709_v36 }
 0x1dc   : > { %v717_v40 = vpack.c.bf16 %v708_v38, %v707_v25  ;;  %1744 = vmatpush3.bf16.msra.mxu1 %v2537_v45 }
 0x1dd   : > { %1737 = vmatprep.subr.bf16.mxu1 %v1857_v20 }
 0x1de   : > { %1655 = vmatprep.mubr.bf16.mxu1 %v717_v40 }
 0x1df   : > { %1656 = vmatmul.mubr.bf16.gmra.mrb[12].mxu1 %v718_v39 }
 0x1e0   : > { %1745 = vmatpush3.bf16.msra.mxu1 %v1857_v20 }
 0x1e1   : > { %1738 = vmatprep.subr.bf16.mxu1 %v1858_v22 }
 0x1e4   : > { %1746 = vmatpush3.bf16.msra.mxu1 %v1858_v22 }
 0x29a   : > { %v1645_v42 = vpop.f32.mrb[0].mxu1 }
 0x29b   : > { %v833_v43 = vadd.f32 %v1645_v42, %v1492_v41  ;;  %v824_v44 = vpop.f32.mrb[1].mxu1 }
 0x29c   : > { %v825_v45 = vadd.f32 %v1492_v41, %v824_v44  ;;  %v1646_v46 = vpop.f32.mrb[2].mxu1 }
 0x29d   : > { %v836_v47 = vadd.f32 %v1646_v46, %v1492_v41  ;;  %v827_v48 = vpop.f32.mrb[3].mxu1  ;;  %v889_v50 = vmax.f32 %v833_v43, 0.0 }
 0x29e   : > { %v828_v49 = vadd.f32 %v1492_v41, %v827_v48  ;;  %v887_v52 = vmax.f32 %v825_v45, 0.0 }
 0x29f   : > { %v890_v51 = vmax.f32 %v836_v47, 0.0 }
 0x2a0   : > { %v888_v53 = vmax.f32 %v828_v49, 0.0 }
 0x2a1   : > { %v904_v54 = vpack.c.bf16 %v890_v51, %v889_v50 }
 0x2a2   : > { %v903_v55 = vpack.c.bf16 %v888_v53, %v887_v52  ;;  %v1649_v56 = vpop.f32.mrb[4].mxu1 }
 0x2a3   : > { %v849_v57 = vadd.f32 %v1649_v56, %v1492_v41  ;;  %v840_v58 = vpop.f32.mrb[5].mxu1 }
 0x2a4   : > { %v841_v59 = vadd.f32 %v1492_v41, %v840_v58  ;;  %v1650_v60 = vpop.f32.mrb[6].mxu1  ;;  %1675 = vmatprep.mubr.bf16.mxu0 %v903_v55 }
 0x2a5   : > { %v852_v61 = vadd.f32 %v1650_v60, %v1492_v41  ;;  %v843_v62 = vpop.f32.mrb[7].mxu1  ;;  %1676 = vmatmul.mubr.bf16.vlgmr.msra.gmra.mrb[16].mxu0 %v904_v54  ;;  %v893_v2 = vmax.f32 %v849_v57, 0.0 }
 0x2a6   : > { %v844_v63 = vadd.f32 %v1492_v41, %v843_v62  ;;  %v891_v1 = vmax.f32 %v841_v59, 0.0 }
 0x2a7   : > { %v894_v0 = vmax.f32 %v852_v61, 0.0 }
 0x2a8   : > { %v892_v3 = vmax.f32 %v844_v63, 0.0 }
 0x2a9   : > { %v906_v4 = vpack.c.bf16 %v894_v0, %v893_v2 }
 0x2aa   : > { %v905_v5 = vpack.c.bf16 %v892_v3, %v891_v1  ;;  %v1653_v9 = vpop.f32.mrb[8].mxu1 }
 0x2ab   : > { %v865_v11 = vadd.f32 %v1653_v9, %v1492_v41  ;;  %v856_v12 = vpop.f32.mrb[9].mxu1 }
 0x2ac   : > { %v857_v16 = vadd.f32 %v1492_v41, %v856_v12  ;;  %v1654_v8 = vpop.f32.mrb[10].mxu1  ;;  %1679 = vmatprep.mubr.bf16.mxu0 %v905_v5 }
 0x2ad   : > { %v868_v10 = vadd.f32 %v1654_v8, %v1492_v41  ;;  %v859_v18 = vpop.f32.mrb[11].mxu1  ;;  %1680 = vmatmul.mubr.bf16.gmra.mrb[20].mxu0 %v906_v4  ;;  %v897_v7 = vmax.f32 %v865_v11, 0.0 }
 0x2ae   : > { %v860_v6 = vadd.f32 %v1492_v41, %v859_v18  ;;  %v895_v21 = vmax.f32 %v857_v16, 0.0 }
 0x2af   : > { %v898_v19 = vmax.f32 %v868_v10, 0.0 }
 0x2b0   : > { %v896_v23 = vmax.f32 %v860_v6, 0.0 }
 0x2b1   : > { %v908_v26 = vpack.c.bf16 %v898_v19, %v897_v7 }
 0x2b2   : > { %v907_v27 = vpack.c.bf16 %v896_v23, %v895_v21  ;;  %v1657_v28 = vpop.f32.mrb[12].mxu1 }
 0x2b3   : > { %v881_v29 = vadd.f32 %v1657_v28, %v1492_v41  ;;  %v872_v15 = vpop.f32.mrb[13].mxu1 }
 0x2b4   : > { %v873_v30 = vadd.f32 %v1492_v41, %v872_v15  ;;  %v1658_v17 = vpop.f32.mrb[14].mxu1  ;;  %1683 = vmatprep.mubr.bf16.mxu1 %v907_v27 }
 0x2b5   : > { %v884_v31 = vadd.f32 %v1658_v17, %v1492_v41  ;;  %v875_v13 = vpop.f32.mrb[15].mxu1  ;;  %1684 = vmatmul.mubr.bf16.vlgmr.msra.gmra.mrb[16].mxu1 %v908_v26  ;;  %v901_v32 = vmax.f32 %v881_v29, 0.0 }
 0x2b6   : > { %v876_v14 = vadd.f32 %v1492_v41, %v875_v13  ;;  %v899_v34 = vmax.f32 %v873_v30, 0.0 }
 0x2b7   : > { %v902_v33 = vmax.f32 %v884_v31, 0.0 }
 0x2b8   : > { %v900_v35 = vmax.f32 %v876_v14, 0.0 }
 0x2b9   : > { %v910_v36 = vpack.c.bf16 %v902_v33, %v901_v32 }
 0x2ba   : > { %v909_v37 = vpack.c.bf16 %v900_v35, %v899_v34 }
 0x2bc   : > { %1687 = vmatprep.mubr.bf16.mxu1 %v909_v37 }
 0x2bd   : > { %1688 = vmatmul.mubr.bf16.gmra.mrb[20].mxu1 %v910_v36 }
 0x378   : > { %v1677_v25 = vpop.f32.mrb[16].mxu0 }
 0x379   : > { %v2578_v38 = vadd.f32 %v1677_v25, %v1501_v24  ;;  %v1016_v39 = vpop.f32.mrb[17].mxu0 }
 0x37a   : > { %v2580_v40 = vadd.f32 %v1501_v24, %v1016_v39  ;;  %v1678_v20 = vpop.f32.mrb[18].mxu0 }
 0x37b   : > { %1081 = vst [vmem:[#allocation2 + $0x10] sm:$0xff] %v2578_v38  ;;  %v2583_v22 = vadd.f32 %v1678_v20, %v1501_v24  ;;  %v1019_v41 = vpop.f32.mrb[19].mxu0 }
 0x37c   : > { %1079 = vst [vmem:[#allocation2] sm:$0xff] %v2580_v40  ;;  %v2586_v42 = vadd.f32 %v1501_v24, %v1019_v41 }
 0x37d   : > { %1082 = vst [vmem:[#allocation2 + $0x18] sm:$0xff] %v2583_v22 }
 0x37e   : > { %1080 = vst [vmem:[#allocation2 + $0x8] sm:$0xff] %v2586_v42 }
 0x380   : > { %v1681_v43 = vpop.f32.mrb[20].mxu0 }
 0x381   : > { %v2590_v44 = vadd.f32 %v1681_v43, %v1501_v24  ;;  %v1032_v45 = vpop.f32.mrb[21].mxu0 }
 0x382   : > { %v2592_v46 = vadd.f32 %v1501_v24, %v1032_v45  ;;  %v1682_v47 = vpop.f32.mrb[22].mxu0  ;;  %v1101_v5 = vld [vmem:[#allocation2 + $0x10] sm:$0xff] (!%p1510_p11) }
 0x383   : > { %1085 = vst [vmem:[#allocation2 + $0x30] sm:$0xff] %v2590_v44  ;;  %v2595_v48 = vadd.f32 %v1682_v47, %v1501_v24  ;;  %v1035_v49 = vpop.f32.mrb[23].mxu0  ;;  %v1099_v3 = vld [vmem:[#allocation2] sm:$0xff] (!%p1510_p11)  ;;  %v1117_v12 = vmax.f32 (!%p1510_p11), %v1101_v5, 0.0 }
 0x384   : > { %1083 = vst [vmem:[#allocation2 + $0x20] sm:$0xff] %v2592_v46  ;;  %v2598_v50 = vadd.f32 %v1501_v24, %v1035_v49  ;;  %v1115_v9 = vmax.f32 (!%p1510_p11), %v1099_v3, 0.0  ;;  %v1102_v16 = vld [vmem:[#allocation2 + $0x18] sm:$0xff] (!%p1510_p11) }
 0x385   : > { %1086 = vst [vmem:[#allocation2 + $0x38] sm:$0xff] %v2595_v48  ;;  %v1100_v4 = vld [vmem:[#allocation2 + $0x8] sm:$0xff] (!%p1510_p11)  ;;  %v1118_v18 = vmax.f32 (!%p1510_p11), %v1102_v16, 0.0  ;;  %1133 = vst [vmem:[#allocation2 + $0x10] sm:$0xff] (!%p1510_p11), %v1117_v12 }
 0x386   : > { %1084 = vst [vmem:[#allocation2 + $0x28] sm:$0xff] %v2598_v50  ;;  %v1116_v11 = vmax.f32 (!%p1510_p11), %v1100_v4, 0.0  ;;  %1131 = vst [vmem:[#allocation2] sm:$0xff] (!%p1510_p11), %v1115_v9 }
 0x387   : > { %1134 = vst [vmem:[#allocation2 + $0x18] sm:$0xff] (!%p1510_p11), %v1118_v18 }
 0x388   : > { %v1685_v51 = vpop.f32.mrb[16].mxu1  ;;  %1132 = vst [vmem:[#allocation2 + $0x8] sm:$0xff] (!%p1510_p11), %v1116_v11 }
 0x389   : > { %v2602_v52 = vadd.f32 %v1685_v51, %v1501_v24  ;;  %v1048_v53 = vpop.f32.mrb[17].mxu1 }
 0x38a   : > { %v2604_v54 = vadd.f32 %v1501_v24, %v1048_v53  ;;  %v1686_v55 = vpop.f32.mrb[18].mxu1  ;;  %v1105_v19 = vld [vmem:[#allocation2 + $0x30] sm:$0xff] (!%p1510_p11) }
 0x38b   : > { %1089 = vst [vmem:[#allocation2 + $0x50] sm:$0xff] %v2602_v52  ;;  %v2607_v56 = vadd.f32 %v1686_v55, %v1501_v24  ;;  %v1051_v57 = vpop.f32.mrb[19].mxu1  ;;  %v1103_v8 = vld [vmem:[#allocation2 + $0x20] sm:$0xff] (!%p1510_p11)  ;;  %v1121_v26 = vmax.f32 (!%p1510_p11), %v1105_v19, 0.0 }
 0x38c   : > { %1087 = vst [vmem:[#allocation2 + $0x40] sm:$0xff] %v2604_v54  ;;  %v2610_v58 = vadd.f32 %v1501_v24, %v1051_v57  ;;  %v1119_v6 = vmax.f32 (!%p1510_p11), %v1103_v8, 0.0  ;;  %v1106_v21 = vld [vmem:[#allocation2 + $0x38] sm:$0xff] (!%p1510_p11) }
 0x38d   : > { %1090 = vst [vmem:[#allocation2 + $0x58] sm:$0xff] %v2607_v56  ;;  %v1104_v10 = vld [vmem:[#allocation2 + $0x28] sm:$0xff] (!%p1510_p11)  ;;  %v1122_v27 = vmax.f32 (!%p1510_p11), %v1106_v21, 0.0  ;;  %1137 = vst [vmem:[#allocation2 + $0x30] sm:$0xff] (!%p1510_p11), %v1121_v26 }
 0x38e   : > { %1088 = vst [vmem:[#allocation2 + $0x48] sm:$0xff] %v2610_v58  ;;  %v1120_v7 = vmax.f32 (!%p1510_p11), %v1104_v10, 0.0  ;;  %1135 = vst [vmem:[#allocation2 + $0x20] sm:$0xff] (!%p1510_p11), %v1119_v6 }
 0x38f   : > { %1138 = vst [vmem:[#allocation2 + $0x38] sm:$0xff] (!%p1510_p11), %v1122_v27 }
 0x390   : > { %v1689_v59 = vpop.f32.mrb[20].mxu1  ;;  %1098 = sbr.rel (%p1510_p11) target bundleno = 929 (0x3a1), region = 88  ;;  %1136 = vst [vmem:[#allocation2 + $0x28] sm:$0xff] (!%p1510_p11), %v1120_v7 }
 0x391   : > { %v2614_v60 = vadd.f32 %v1689_v59, %v1501_v24  ;;  %v1064_v61 = vpop.f32.mrb[21].mxu1 }
 0x392   : > { %v2616_v62 = vadd.f32 %v1501_v24, %v1064_v61  ;;  %v1690_v63 = vpop.f32.mrb[22].mxu1  ;;  %v1109_v15 = vld [vmem:[#allocation2 + $0x50] sm:$0xff] (!%p1510_p11) }
 0x393   : > { %1093 = vst [vmem:[#allocation2 + $0x70] sm:$0xff] %v2614_v60  ;;  %v2619_v2 = vadd.f32 %v1690_v63, %v1501_v24  ;;  %v1067_v0 = vpop.f32.mrb[23].mxu1  ;;  %v1107_v23 = vld [vmem:[#allocation2 + $0x40] sm:$0xff] (!%p1510_p11)  ;;  %v1125_v31 = vmax.f32 (!%p1510_p11), %v1109_v15, 0.0 }
 0x394   : > { %1091 = vst [vmem:[#allocation2 + $0x60] sm:$0xff] %v2616_v62  ;;  %v2622_v1 = vadd.f32 %v1501_v24, %v1067_v0  ;;  %v1123_v28 = vmax.f32 (!%p1510_p11), %v1107_v23, 0.0  ;;  %v1110_v30 = vld [vmem:[#allocation2 + $0x58] sm:$0xff] (!%p1510_p11) }
 0x395   : > { %1094 = vst [vmem:[#allocation2 + $0x78] sm:$0xff] %v2619_v2  ;;  %v1108_v29 = vld [vmem:[#allocation2 + $0x48] sm:$0xff] (!%p1510_p11)  ;;  %v1126_v13 = vmax.f32 (!%p1510_p11), %v1110_v30, 0.0  ;;  %1141 = vst [vmem:[#allocation2 + $0x50] sm:$0xff] (!%p1510_p11), %v1125_v31 }
 0x396   : > { %1092 = vst [vmem:[#allocation2 + $0x68] sm:$0xff] %v2622_v1  ;;  %v1124_v17 = vmax.f32 (!%p1510_p11), %v1108_v29, 0.0  ;;  %1139 = vst [vmem:[#allocation2 + $0x40] sm:$0xff] (!%p1510_p11), %v1123_v28 }
 0x397   : > { %1142 = vst [vmem:[#allocation2 + $0x58] sm:$0xff] %v1126_v13 }
 0x398   : > { %1140 = vst [vmem:[#allocation2 + $0x48] sm:$0xff] %v1124_v17 }
 0x39a   : > { %v1113_v33 = vld [vmem:[#allocation2 + $0x70] sm:$0xff] }
 0x39b   : > { %v1111_v14 = vld [vmem:[#allocation2 + $0x60] sm:$0xff]  ;;  %v1129_v36 = vmax.f32 %v1113_v33, 0.0 }
 0x39c   : > { %v1127_v34 = vmax.f32 %v1111_v14, 0.0  ;;  %v1114_v37 = vld [vmem:[#allocation2 + $0x78] sm:$0xff] }
 0x39d   : > { %v1112_v32 = vld [vmem:[#allocation2 + $0x68] sm:$0xff]  ;;  %v1130_v24 = vmax.f32 %v1114_v37, 0.0  ;;  %1145 = vst [vmem:[#allocation2 + $0x70] sm:$0xff] %v1129_v36 }
 0x39e   : > { %v1128_v35 = vmax.f32 %v1112_v32, 0.0  ;;  %1143 = vst [vmem:[#allocation2 + $0x60] sm:$0xff] %v1127_v34 }
 0x39f   : > { %1146 = vst [vmem:[#allocation2 + $0x78] sm:$0xff] %v1130_v24 }
 0x3a0   : > { %1144 = vst [vmem:[#allocation2 + $0x68] sm:$0xff] %v1128_v35 }
 0x3a1 PF: > { %p1511_p1 = scmp.ne.s32.totalorder %s2205_s17, 1 }
 0x3a2   : > { %v1153_v25 = vpack.c.bf16 (!%p1511_p1), %v2586_v42, %v2580_v40  ;;  %v2126_v39 = vmov (!%p1511_p1), 0.0   ;;  %v1860_v20 = vld [vmem:[#allocation12] sm:$0xff] (!%p1511_p1)   ;;  %v1154_v41 = vpack.c.bf16 (!%p1511_p1), %v2583_v22, %v2578_v38  ;;  %vm2127_vm0 = vmmov (!%p1511_p1), 0   ;;  %v1861_v43 = vld [vmem:[#allocation12 + $0x8] sm:$0xff] (!%p1511_p1)   ;;  %v1862_v40 = vld [vmem:[#allocation12 + $0x10] sm:$0xff] (!%p1511_p1)   ;;  %s2744_s8 = sld [smem:[#allocation28_spill]] (!%p1511_p1) }
 0x3a3   : > { %1150 = sbr.rel (%p1511_p1) target bundleno = 1396 (0x574), region = 92  ;;  %1691 = vmatprep.subr.bf16.mxu0 (!%p1511_p1), %v2126_v39  ;;  %1711 = vmatprep.subr.bf16.mxu1 (!%p1511_p1), %v2126_v39  ;;  %v1155_v45 = vpack.c.bf16 (!%p1511_p1), %v2598_v50, %v2592_v46  ;;  %v1156_v38 = vpack.c.bf16 (!%p1511_p1), %v2595_v48, %v2590_v44  ;;  %v1863_v22 = vld [vmem:[#allocation12 + $0x18] sm:$0xff] (!%p1511_p1)   ;;  %v1157_v42 = vpack.c.bf16 (!%p1511_p1), %v2610_v58, %v2604_v54  ;;  %v1864_v47 = vld [vmem:[#allocation12 + $0x20] sm:$0xff] (!%p1511_p1)   ;;  %v1865_v49 = vld [vmem:[#allocation12 + $0x28] sm:$0xff] (!%p1511_p1)   ;;  %s2745_s27 = sld [smem:[#allocation29_spill]] (!%p1511_p1) }
 0x3a4   : > { %1692 = vmatpush3.bf16.msra.mxu0 (!%p1511_p1), %v1153_v25  ;;  %1707 = vmatprep.mubr.msk.bf16.mxu0 (!%p1511_p1), %vm2127_vm0, %v2126_v39  ;;  %v1158_v46 = vpack.c.bf16 (!%p1511_p1), %v2607_v56, %v2602_v52  ;;  %v1159_v44 = vpack.c.bf16 (!%p1511_p1), %v2622_v1, %v2616_v62  ;;  %v1866_v48 = vld [vmem:[#allocation12 + $0x30] sm:$0xff] (!%p1511_p1)   ;;  %v1160_v50 = vpack.c.bf16 (!%p1511_p1), %v2619_v2, %v2614_v60  ;;  %v1867_v52 = vld [vmem:[#allocation12 + $0x38] sm:$0xff] (!%p1511_p1)  }
 0x3a5   : > { %1693 = vmatprep.subr.bf16.mxu0 (!%p1511_p1), %v2126_v39  ;;  %1712 = vmatpush3.bf16.msra.mxu1 (!%p1511_p1), %v1860_v20 }
 0x3a6   : > { %1727 = vmatprep.mubr.msk.bf16.mxu1 (!%p1511_p1), %vm2127_vm0, %v2126_v39  ;;  %1713 = vmatprep.subr.bf16.mxu1 (!%p1511_p1), %v2126_v39 }
 0x3a8   : > { %1694 = vmatpush3.bf16.msra.mxu0 (!%p1511_p1), %v1154_v41  ;;  %v1859_v51 = vld [vmem:[%s2744_s8] sm:$0xff] (!%p1511_p1)  }
 0x3a9   : > { %1695 = vmatprep.subr.bf16.mxu0 (!%p1511_p1), %v2126_v39  ;;  %1714 = vmatpush3.bf16.msra.mxu1 (!%p1511_p1), %v1861_v43  ;;  %v1513_v58 = vld [vmem:[%s2745_s27] ss:$0 sm:$0xff] (!%p1511_p1) }
 0x3aa   : > { %1715 = vmatprep.subr.bf16.mxu1 %v2126_v39 }
 0x3ac   : > { %1696 = vmatpush3.bf16.msra.mxu0 %v1155_v45 }
 0x3ad   : > { %1697 = vmatprep.subr.bf16.mxu0 %v2126_v39  ;;  %1716 = vmatpush3.bf16.msra.mxu1 %v1862_v40 }
 0x3ae   : > { %1717 = vmatprep.subr.bf16.mxu1 %v2126_v39 }
 0x3b0   : > { %1698 = vmatpush3.bf16.msra.mxu0 %v1156_v38 }
 0x3b1   : > { %1699 = vmatprep.subr.bf16.mxu0 %v2126_v39  ;;  %1718 = vmatpush3.bf16.msra.mxu1 %v1863_v22 }
 0x3b2   : > { %1719 = vmatprep.subr.bf16.mxu1 %v2126_v39 }
 0x3b4   : > { %1700 = vmatpush3.bf16.msra.mxu0 %v1157_v42 }
 0x3b5   : > { %1701 = vmatprep.subr.bf16.mxu0 %v2126_v39  ;;  %1720 = vmatpush3.bf16.msra.mxu1 %v1864_v47 }
 0x3b6   : > { %1721 = vmatprep.subr.bf16.mxu1 %v2126_v39 }
 0x3b8   : > { %1702 = vmatpush3.bf16.msra.mxu0 %v1158_v46 }
 0x3b9   : > { %1703 = vmatprep.subr.bf16.mxu0 %v2126_v39  ;;  %1722 = vmatpush3.bf16.msra.mxu1 %v1865_v49 }
 0x3ba   : > { %1723 = vmatprep.subr.bf16.mxu1 %v2126_v39 }
 0x3bc   : > { %1704 = vmatpush3.bf16.msra.mxu0 %v1159_v44 }
 0x3bd   : > { %1705 = vmatprep.subr.bf16.mxu0 %v2126_v39  ;;  %1724 = vmatpush3.bf16.msra.mxu1 %v1866_v48 }
 0x3be   : > { %1725 = vmatprep.subr.bf16.mxu1 %v2126_v39 }
 0x3c0   : > { %1706 = vmatpush3.bf16.msra.mxu0 %v1160_v50 }
 0x3c1   : > { %1726 = vmatpush3.bf16.msra.mxu1 %v1867_v52 }
 0x3c3   : > { %1708 = vmatmul.mubr.bf16.vlgmr.msra.gmra.mrb[0].mxu0 %v1859_v51 }
 0x496   : > { %v1201_v53 = vpop.f32.mrb[0].mxu0 }
 0x497   : > { %v1709_v54 = vpop.f32.mrb[1].mxu0 }
 0x498   : > { %v1204_v55 = vpop.f32.mrb[2].mxu0 }
 0x499   : > { %v1208_v56 = vpack.c.bf16 %v1204_v55, %v1201_v53  ;;  %v1710_v57 = vpop.f32.mrb[3].mxu0 }
 0x49b   : > { %1728 = vmatmul.mubr.bf16.vlgmr.msra.gmra.mrb[0].mxu1 %v1208_v56 }
 0x56e   : > { %v1314_v59 = vpop.f32.mrb[0].mxu1 }
 0x56f   : > { %v1315_v60 = vadd.f32 %v1513_v58, %v1314_v59  ;;  %v1729_v61 = vpop.f32.mrb[1].mxu1 }
 0x570   : > { %v1317_v62 = vpop.f32.mrb[2].mxu1 }
 0x571   : > { %1321 = vst [vmem:[#allocation13] sm:$0xff] %v1315_v60  ;;  %v1318_v63 = vadd.f32 %v1513_v58, %v1317_v62  ;;  %v1730_v2 = vpop.f32.mrb[3].mxu1 }
 0x573   : > { %1322 = vst [vmem:[#allocation13 + $0x8] sm:$0xff] %v1318_v63 }
 0x574 PF: > { %p1791_p4 = scmp.eq.s32.totalorder %s2205_s17, 1  ;;  %s2128_s21 = smov [#allocation13]  }
 0x575   : > { %s1329_s29 = sshll.u32 %s2128_s21, 4  ;;  %s1330_s29 = int_to_ptr.vmem [resolvable:$true] %s1329_s29 }
 0x576   : > { %s2040_s16 = scalar_lea.vmem %s1330_s29, 256  ;;  %p2047_p9 = scmp.lt.s32.totalorder %s1330_s29, %s1330_s29 }
 0x577   : > { %p2041_p7 = scmp.ne.s32.totalorder %s1330_s29, %s2040_s16  ;;  %p2048_p10 = scmp.lt.s32.totalorder %s2040_s16, %s2040_s16 }
 0x579   : > { %p2042_p12 = pnand %p2041_p7, %p1791_p4  ;;  %p2049_p6 = por %p2048_p10, %p2047_p9 }
 0x57b   : > { %p2043_p5 = pneg %p2042_p12 }
 0x57d   : > { %p2050_p13 = pnand %p2049_p6, %p2043_p5 }
 0x57f   : > { %2053 = shalt.err (!%p2050_p13)
}
 0x580   : > { %s2746_s15 = sld [smem:[#allocation30_spill]] }
 0x586   : > { %s2747_s10 = smov %s2746_s15  ;;  %s2054_s18 = scalar_lea.hbm %s2746_s15, 256 }
 0x587   : > { %p2055_p2 = scmp.ne.s32.totalorder %s2747_s10, %s2054_s18  ;;  %p2060_p8 = scmp.lt.u32.totalorder %s2054_s18, %s2747_s10 }
 0x589   : > { %p2056_p3 = pnand %p2055_p2, %p1791_p4 }
 0x58b   : > { %p2057_p0 = pneg %p2056_p3 }
 0x58d   : > { %p2062_p11 = pnand %p2060_p8, %p2057_p0 }
 0x58f   : > { %2065 = shalt.err (!%p2062_p11)
}
 0x590   : > { %s2129_s24 = smov 128   ;;  %s2130_s22 = smov 8  }
 0x591   : > { %1765 = dma.vmem_to_hbm [thread:$0]  (%p1791_p4), %s1330_s29, 256, %s2747_s10, [#allocation6], %s2129_s24, %s2129_s24, %s2130_s22  }
 0x592   : > { %2099 = dma.done.wait (%p1791_p4), [#allocation6], 256  }
 0x593   : > { %2101 = vsyncadd (%p1791_p4), [#allocation6], 4294967040 }
 0x594 PF: > { %s2748_s16 = sld [smem:[#allocation24_spill]]  ;;  %s2749_s26 = sld [smem:[#allocation23_spill]] }
 0x595   : > { %s2750_s15 = sld [smem:[#allocation25_spill]]  ;;  %s2751_s13 = smov %s2108_s14 }
 0x59a   : > { %p25_p1 = scmp.ge.s32.totalorder %s2748_s16, 4   ;;  %s2752_s14 = smov %s2749_s26 }
 0x59c   :  { %27 = sbr.rel (!%p25_p1) target bundleno = 13 (0xd), region = 147 }
 0x5a3   :  { %1345 = vsyncpa [#allocation5], 1 }
 0x5a4   :  { %1347 = vsyncpa [#allocation5 + $0x1], 1 }
 0x5a5   :  { %1348 = vsyncpa [#allocation8], 1 }
 0x5a6   :  { %1350 = vsyncpa [#allocation8 + $0x1], 1 }
 0x5a7   :  { %1351 = vsyncpa [#allocation11], 1 }
 0x5a8   :  { %1352 = vsyncpa [#allocation6], 1 }
 0x5a9   :  { %1354 = vsyncpa [#allocation6 + $0x1], 1 }
 0x5aa   :  { %1355 = vsyncmov [#allocation3] }
 0x5ad   :  { %s1356_s17 = vpop.sfrf %1355 }
 0x5ae   :  { %p1526_p4 = scmp.ne.s32.totalorder %s1356_s17, 0 }
 0x5b0   :  { %1360 = shalt.err (%p1526_p4)  }

</bundles_post_ra>
